<compile_context>
chip_gen: v5e
topology: v5e:2x2
jax: 0.10.0
libtpu: 0.0.40
codegen_flags: <defaults>
</compile_context>

<pallas_src>
import math

import jax
import jax.numpy as jnp
from jax.experimental import pallas as pl
from jax.experimental.pallas import tpu as pltpu

IN_FEATURES = 1 * 28 * 28        # 784 (multiple of 8 sublanes; full-array K block)
HIDDEN = 512
OUT_FEATURES = 1
DEFAULT_TILE_B = 512             # v6e/v7x sweet spot; fine on v5e (MXU-bound there)
_SPLIT_THRESHOLD = 256           # batches >= this always get >= 2 tiles (v7x megacore)


def _round_up(n, m):
    return ((n + m - 1) // m) * m


def d_forward_kernel(x_ref, w1_ref, b1_ref, w2_ref, b2_ref, o_ref):
    # fc1: cast the activation tile to bf16 in-kernel (no wrapper pad/cast pass),
    # f32 accumulation on the MXU.
    x_bf16 = x_ref[...].astype(jnp.bfloat16)                       # (TB, 784)
    h = jnp.dot(x_bf16, w1_ref[...],
                preferred_element_type=jnp.float32)                # (TB, 512) f32
    h = h + b1_ref[...]                                            # bias (VPU, f32)
    h = jnp.where(h > 0, h, 0.1 * h)                               # LeakyReLU(0.1)

    # fc2 (N=1), lane-dense: w2 is an (8, 512) slab whose row 0 is the real weight
    # row (rows 1..7 zero).  Contracting both operands on their last dim (the
    # q @ k^T pattern) gives an (8, TB) result in lane-major layout, so the bias,
    # sigmoid and store all run on dense lanes with an unmasked vst.
    z8 = jax.lax.dot_general(w2_ref[...], h,
                             dimension_numbers=(((1,), (1,)), ((), ())),
                             preferred_element_type=jnp.float32)   # (8, TB)
    z = z8[0:1, :] + b2_ref[...]                                   # (1, TB)

    # Sigmoid: clamp so exp(-z) can never overflow before the EUP approx reciprocal.
    z = jnp.maximum(z, -30.0)
    o_ref[...] = pl.reciprocal(1.0 + jnp.exp(-z), approx=True)


def prepare_params(w1, b1, w2, b2):
    """One-time packing of parameters into kernel-ready layout.

    w1: (784, 512), b1: (512,), w2: (512, 1) or (512,), b2: (1,) — already in
    `x @ W` layout (i.e. the transpose of nn.Linear's stored weight).
    """
    w1_bf16 = jnp.asarray(w1, jnp.float32).astype(jnp.bfloat16)        # (784, 512)
    b1_2d = jnp.asarray(b1, jnp.float32).reshape(1, HIDDEN)            # (1, 512)
    w2_vec = jnp.asarray(w2, jnp.float32).reshape(HIDDEN)
    w2_rows = jnp.zeros((8, HIDDEN), jnp.float32).at[0, :].set(w2_vec)  # (8, 512)
    b2_2d = jnp.asarray(b2, jnp.float32).reshape(1, OUT_FEATURES)      # (1, 1)
    return w1_bf16, b1_2d, w2_rows, b2_2d


def _choose_tile_b(B, tile_b):
    if B < _SPLIT_THRESHOLD:
        return _round_up(B, 8)                     # one right-sized tile
    # Multi-tile path: tiles are multiples of 128 (legal lane-dense output blocks,
    # aligned MXU M dim) and there are always >= 2 tiles so v7x megacore gets both
    # TensorCores busy.  VMEM is not the limiter at this size on any generation.
    half = _round_up(pl.cdiv(B, 2), 128)
    return max(128, min(_round_up(tile_b, 128), half))


def _x_block_spec(tile_b, num_tiles):
    index_map = lambda i: (i, 0)
    if num_tiles >= 3:
        # Deeper x pipelining hides DMA issue latency/jitter in the HBM-bound regime.
        try:
            return pl.BlockSpec((tile_b, IN_FEATURES), index_map,
                                pipeline_mode=pl.Buffered(3))
        except TypeError:   # older BlockSpec signature: fall back to default depth
            pass
    return pl.BlockSpec((tile_b, IN_FEATURES), index_map)


def d_forward(x_nchw, params, *, tile_b=DEFAULT_TILE_B):
    """Discriminator forward pass.

    x_nchw: (B, 1, 28, 28) float32 (or bfloat16), PyTorch NCHW convention.
    params: output of prepare_params(...)
    returns (B, 1) float32 in (0, 1)
    """
    w1_bf16, b1_2d, w2_rows, b2_2d = params

    B = x_nchw.shape[0]
    x = x_nchw.reshape(B, IN_FEATURES)             # free reshape; no pad, no cast
    if x.dtype not in (jnp.float32, jnp.bfloat16):
        x = x.astype(jnp.float32)

    tile_b = _choose_tile_b(B, tile_b)
    num_tiles = pl.cdiv(B, tile_b)                 # ragged last tile handled by Pallas
    rows = num_tiles * tile_b

    cost = pl.CostEstimate(
        flops=2 * rows * IN_FEATURES * HIDDEN + 2 * rows * HIDDEN,
        transcendentals=rows,
        bytes_accessed=(rows * IN_FEATURES * x.dtype.itemsize
                        + w1_bf16.size * 2
                        + (b1_2d.size + w2_rows.size + b2_2d.size) * 4
                        + rows * 4),
    )

    out = pl.pallas_call(
        d_forward_kernel,
        out_shape=jax.ShapeDtypeStruct((1, rows), jnp.float32),
        grid=(num_tiles,),
        in_specs=[
            _x_block_spec(tile_b, num_tiles),                       # x: tiled over batch
            pl.BlockSpec((IN_FEATURES, HIDDEN), lambda i: (0, 0)),  # W1: VMEM-resident
            pl.BlockSpec((1, HIDDEN), lambda i: (0, 0)),            # b1: resident
            pl.BlockSpec((8, HIDDEN), lambda i: (0, 0)),            # w2 slab: resident
            pl.BlockSpec((1, OUT_FEATURES), lambda i: (0, 0)),      # b2: resident
        ],
        out_specs=pl.BlockSpec((1, tile_b), lambda i: (0, i)),      # lane-dense row
        compiler_params=pltpu.CompilerParams(
            dimension_semantics=("parallel",),
        ),
        cost_estimate=cost,
    )(x, w1_bf16, b1_2d, w2_rows, b2_2d)

    return out[0, :B].reshape(B, OUT_FEATURES)


def init_params(key):
    """Deterministic init matching nn.Linear defaults: U(-1/sqrt(fan_in), 1/sqrt(fan_in))."""
    k1, k2, k3, k4 = jax.random.split(key, 4)
    bound1 = 1.0 / math.sqrt(IN_FEATURES)
    bound2 = 1.0 / math.sqrt(HIDDEN)
    w1 = jax.random.uniform(k1, (IN_FEATURES, HIDDEN), jnp.float32, -bound1, bound1)
    b1 = jax.random.uniform(k2, (HIDDEN,), jnp.float32, -bound1, bound1)
    w2 = jax.random.uniform(k3, (HIDDEN, OUT_FEATURES), jnp.float32, -bound2, bound2)
    b2 = jax.random.uniform(k4, (OUT_FEATURES,), jnp.float32, -bound2, bound2)
    return w1, b1, w2, b2


if __name__ == "__main__":
    key = jax.random.PRNGKey(0)
    k_params, k_x = jax.random.split(key)

    w1, b1, w2, b2 = init_params(k_params)
    params = prepare_params(w1, b1, w2, b2)

    # Small batch of MNIST-shaped inputs, NCHW like PyTorch.
    B = 2
    x = jax.random.normal(k_x, (B, 1, 28, 28), jnp.float32)

    out = jax.block_until_ready(d_forward(x, params))

    # Reference in plain JAX with the same bf16-operand / f32-accumulate fc1,
    # so the comparison isolates kernel correctness from bf16 rounding.
    xf = x.reshape(B, IN_FEATURES)
    h_ref = jnp.dot(xf.astype(jnp.bfloat16), w1.astype(jnp.bfloat16),
                    preferred_element_type=jnp.float32) + b1
    h_ref = jnp.where(h_ref > 0, h_ref, 0.1 * h_ref)
    ref = jax.nn.sigmoid(h_ref @ w2 + b2)

    assert out.shape == (B, 1)
    # Tolerance covers the EUP approximate-reciprocal sigmoid (~2^-12 relative).
    assert jnp.allclose(out, ref, atol=5e-3, rtol=5e-3), (out, ref)

    print("KERNEL_OK")
</pallas_src>

<mosaic_0001>
module attributes {stable_mosaic.version = 11 : i64} {
  func.func @d_forward_kernel(%arg0: i32, %arg1: memref<8x784xf32, #tpu.memory_space<vmem>>, %arg2: memref<784x512xbf16, #tpu.memory_space<vmem>>, %arg3: memref<1x512xf32, #tpu.memory_space<vmem>>, %arg4: memref<8x512xf32, #tpu.memory_space<vmem>>, %arg5: memref<1x1xf32, #tpu.memory_space<vmem>>, %arg6: memref<1x8xf32, #tpu.memory_space<vmem>>) attributes {dimension_semantics = [#tpu.dimension_semantics<parallel>], iteration_bounds = array<i64: 1>, scalar_prefetch = 0 : i64, scratch_operands = 0 : i64, tpu.core_type = #tpu.core_type<tc>, window_params = [{transform_indices = @transform_0, window_bounds = array<i64: 8, 784>}, {pipeline_mode = #tpu.pipeline_mode<synchronous>, transform_indices = @transform_1, window_bounds = array<i64: 784, 512>}, {pipeline_mode = #tpu.pipeline_mode<synchronous>, transform_indices = @transform_2, window_bounds = array<i64: 1, 512>}, {pipeline_mode = #tpu.pipeline_mode<synchronous>, transform_indices = @transform_3, window_bounds = array<i64: 8, 512>}, {pipeline_mode = #tpu.pipeline_mode<synchronous>, transform_indices = @transform_4, window_bounds = array<i64: 1, 1>}, {transform_indices = @transform_5, window_bounds = array<i64: 1, 8>}]} {
    %c0 = arith.constant 0 : index
    %c0_0 = arith.constant 0 : index
    %0 = vector.load %arg1[%c0, %c0_0] : memref<8x784xf32, #tpu.memory_space<vmem>>, vector<8x784xf32>
    %1 = arith.truncf %0 : vector<8x784xf32> to vector<8x784xbf16>
    %c0_1 = arith.constant 0 : index
    %c0_2 = arith.constant 0 : index
    %2 = vector.load %arg2[%c0_1, %c0_2] : memref<784x512xbf16, #tpu.memory_space<vmem>>, vector<784x512xbf16>
    %cst = arith.constant dense<0.000000e+00> : vector<8x512xf32>
    %3 = tpu.matmul %1, %2, %cst {dimension_numbers = #tpu.dot_dimension_numbers<[1], [0], [0], [1], [0, 0, 1, 1], [], []>} : vector<8x784xbf16>, vector<784x512xbf16>, vector<8x512xf32> -> vector<8x512xf32>
    %c0_3 = arith.constant 0 : index
    %c0_4 = arith.constant 0 : index
    %4 = vector.load %arg3[%c0_3, %c0_4] : memref<1x512xf32, #tpu.memory_space<vmem>>, vector<1x512xf32>
    %5 = vector.broadcast %4 : vector<1x512xf32> to vector<8x512xf32>
    %6 = arith.addf %3, %5 : vector<8x512xf32>
    %cst_5 = arith.constant 0.000000e+00 : f32
    %7 = vector.broadcast %cst_5 : f32 to vector<8x512xf32>
    %8 = arith.cmpf ogt, %6, %7 : vector<8x512xf32>
    %cst_6 = arith.constant 1.000000e-01 : f32
    %9 = vector.broadcast %cst_6 : f32 to vector<8x512xf32>
    %10 = arith.mulf %9, %6 : vector<8x512xf32>
    %11 = arith.select %8, %6, %10 : vector<8x512xi1>, vector<8x512xf32>
    %c0_7 = arith.constant 0 : index
    %c0_8 = arith.constant 0 : index
    %12 = vector.load %arg4[%c0_7, %c0_8] : memref<8x512xf32, #tpu.memory_space<vmem>>, vector<8x512xf32>
    %cst_9 = arith.constant dense<0.000000e+00> : vector<8x8xf32>
    %13 = tpu.matmul %12, %11, %cst_9 {dimension_numbers = #tpu.dot_dimension_numbers<[1], [1], [0], [0], [0, 0, 1, 0], [], []>} : vector<8x512xf32>, vector<8x512xf32>, vector<8x8xf32> -> vector<8x8xf32>
    %14 = vector.extract_strided_slice %13 {offsets = [0, 0], sizes = [1, 8], strides = [1, 1]} : vector<8x8xf32> to vector<1x8xf32>
    %c0_10 = arith.constant 0 : index
    %c0_11 = arith.constant 0 : index
    %15 = vector.load %arg5[%c0_10, %c0_11] : memref<1x1xf32, #tpu.memory_space<vmem>>, vector<1x1xf32>
    %16 = vector.broadcast %15 : vector<1x1xf32> to vector<1x8xf32>
    %17 = arith.addf %14, %16 : vector<1x8xf32>
    %cst_12 = arith.constant -3.000000e+01 : f32
    %18 = vector.broadcast %cst_12 : f32 to vector<1x8xf32>
    %19 = arith.maximumf %17, %18 : vector<1x8xf32>
    %cst_13 = arith.constant 0.000000e+00 : f32
    %20 = vector.broadcast %cst_13 : f32 to vector<1x8xf32>
    %21 = arith.subf %20, %19 : vector<1x8xf32>
    %22 = math.exp %21 : vector<1x8xf32>
    %cst_14 = arith.constant 1.000000e+00 : f32
    %23 = vector.broadcast %cst_14 : f32 to vector<1x8xf32>
    %24 = arith.addf %23, %22 : vector<1x8xf32>
    %25 = tpu.reciprocal %24 {approx = true} : vector<1x8xf32> -> vector<1x8xf32>
    %c0_15 = arith.constant 0 : index
    %c0_16 = arith.constant 0 : index
    %26 = vector.load %arg6[%c0_15, %c0_16] : memref<1x8xf32, #tpu.memory_space<vmem>>, vector<1x8xf32>
    tpu.vector_store %arg6[%c0_15, %c0_16], %25 {strides = array<i32>} : memref<1x8xf32, #tpu.memory_space<vmem>>, vector<1x8xf32>,
    return
  }
  func.func @transform_0(%arg0: i32) -> (i32, i32) {
    %c0_i32 = arith.constant 0 : i32
    %c0_i32_0 = arith.constant 0 : i32
    return %arg0, %c0_i32 : i32, i32
  }
  func.func @transform_1(%arg0: i32) -> (i32, i32) {
    %c0_i32 = arith.constant 0 : i32
    %c0_i32_0 = arith.constant 0 : i32
    %c0_i32_1 = arith.constant 0 : i32
    return %c0_i32, %c0_i32_0 : i32, i32
  }
  func.func @transform_2(%arg0: i32) -> (i32, i32) {
    %c0_i32 = arith.constant 0 : i32
    %c0_i32_0 = arith.constant 0 : i32
    %c0_i32_1 = arith.constant 0 : i32
    return %c0_i32, %c0_i32_0 : i32, i32
  }
  func.func @transform_3(%arg0: i32) -> (i32, i32) {
    %c0_i32 = arith.constant 0 : i32
    %c0_i32_0 = arith.constant 0 : i32
    %c0_i32_1 = arith.constant 0 : i32
    return %c0_i32, %c0_i32_0 : i32, i32
  }
  func.func @transform_4(%arg0: i32) -> (i32, i32) {
    %c0_i32 = arith.constant 0 : i32
    %c0_i32_0 = arith.constant 0 : i32
    %c0_i32_1 = arith.constant 0 : i32
    return %c0_i32, %c0_i32_0 : i32, i32
  }
  func.func @transform_5(%arg0: i32) -> (i32, i32) {
    %c0_i32 = arith.constant 0 : i32
    %c0_i32_0 = arith.constant 0 : i32
    return %c0_i32, %arg0 : i32, i32
  }
}

</mosaic_0001>

<bundles_post_ra>
// kernel: tpu_custom_call.1
= control target key start
LH: loop header
LB: loop body
LE: loop exit
PB: predicated region body
PF: predicated region fallthrough
CT: control target
= control target key end

     0   :  { %s3060_s0 = inlined_call_operand.hbm [shape: f32[2,784], index: 0, kind: input, shape index: {}]   ;;  %s3061_s1 = inlined_call_operand.hbm [shape: bf16[784,512], index: 1, kind: input, shape index: {}]   ;;  %s3062_s2 = inlined_call_operand.hbm [shape: f32[1,512], index: 2, kind: input, shape index: {}]   ;;  %s3063_s3 = inlined_call_operand.hbm [shape: f32[8,512], index: 3, kind: input, shape index: {}]   ;;  %s3064_s4 = inlined_call_operand.<no memory space> [shape: f32[1,1], index: 4, kind: input, shape index: {}]   ;;  %s3065_s5 = inlined_call_operand.hbm [shape: f32[1,8], index: 5, kind: output, shape index: {}]  }
   0x1   :  { %v10_v0 = vstv %s3064_s4 }
   0x2   :  { %11 = vst [vmem:[#allocation2] sm:$0x1] %v10_v0 }
   0x3   :  { %12 = vsyncpa [#allocation4], 0 }
   0x4   :  { %13 = vsyncpa [#allocation7], 0 }
   0x5   :  { %14 = vsyncpa [#allocation10], 0 }
   0x6   :  { %15 = vsyncpa [#allocation5], 0  ;;  %s33_s22 = sshll.u32 %s3061_s1, 4  ;;  %s34_s22 = int_to_ptr.hbm [resolvable:$true] %s33_s22 }
   0x7   :  { %19 = vsyncadd [#allocation4], 672  ;;  %s2947_s23 = smov [#allocation6]   ;;  %s20_s27 = sshll.u32 %s3060_s0, 4  ;;  %s21_s27 = int_to_ptr.hbm [resolvable:$true] %s20_s27 }
   0x8   :  { %s35_s24 = sshll.u32 %s2947_s23, 4  ;;  %s2948_s28 = smov 256   ;;  %s36_s24 = int_to_ptr.vmem [resolvable:$true] %s35_s24 }
   0x9   :  { %s2949_s4 = smov 16   ;;  %s2950_s29 = smov [#allocation3]  }
   0xa   :  { %41 = dma.hbm_to_vmem [thread:$0]  %s34_s22, 25088, %s36_s24, [#allocation7], %s2948_s28, %s2948_s28, %s2949_s4  }
   0xb   :  { %s22_s30 = sshll.u32 %s2950_s29, 4  ;;  %s2951_s6 = smov 224   ;;  %s23_s30 = int_to_ptr.vmem [resolvable:$true] %s22_s30 }
   0xc   :  { %s2952_s7 = smov 14   ;;  %s47_s9 = sshll.u32 %s3062_s2, 4  ;;  %s48_s9 = int_to_ptr.hbm [resolvable:$true] %s47_s9 }
   0xd   :  { %28 = dma.hbm_to_vmem [thread:$0]  %s21_s27, 224, %s23_s30, [#allocation4], %s2951_s6, %s2951_s6, %s2952_s7  }
   0xe   :  { %s2953_s10 = smov [#allocation8]   ;;  %s58_s13 = sshll.u32 %s3063_s3, 4  ;;  %s59_s13 = int_to_ptr.hbm [resolvable:$true] %s58_s13 }
   0xf   :  { %s49_s11 = sshll.u32 %s2953_s10, 4  ;;  %s2954_s14 = smov [#allocation9]   ;;  %s50_s11 = int_to_ptr.vmem [resolvable:$true] %s49_s11 }
  0x10   :  { %52 = dma.hbm_to_vmem [thread:$0]  %s48_s9, 64, %s50_s11, [#allocation7]  }
  0x11   :  { %s60_s15 = sshll.u32 %s2954_s14, 4  ;;  %s61_s15 = int_to_ptr.vmem [resolvable:$true] %s60_s15 }
  0x12   :  { %63 = dma.hbm_to_vmem [thread:$0]  %s59_s13, 512, %s61_s15, [#allocation10]  }
  0x13   :  { %2939 = dma.done.wait [#allocation4], 896  }
  0x14   :  { %2940 = vsyncadd [#allocation4], 4294966400 }
  0x15   :  { %2941 = dma.done.wait [#allocation7], 25152  }
  0x16   :  { %2942 = vsyncadd [#allocation7], 4294942144 }
  0x17   :  { %2943 = dma.done.wait [#allocation10], 512  }
  0x18   :  { %2944 = vsyncadd [#allocation10], 4294966784  ;;  %v1934_v1 = vld [vmem:[#allocation6 + $0xe0] sm:$0xf]  ;;  %v2638_v2 = vld [vmem:[#allocation6 + $0xec] sm:$0xf0] }
  0x19   :  { %v2062_v3 = vld [vmem:[#allocation6 + $0x1e0] sm:$0xf]  ;;  %v1935_v4 = vor.u32 %v2638_v2, %v1934_v1  ;;  %v2670_v5 = vld [vmem:[#allocation6 + $0x1ec] sm:$0xf0]  ;;  %vm1321_vm0 = vcmask 130048   ;;  %s2956_s2 = smov [#allocation11]  }
  0x1a   :  { %v2190_v6 = vld [vmem:[#allocation6 + $0x2e0] sm:$0xf]  ;;  %v2702_v7 = vld [vmem:[#allocation6 + $0x2ec] sm:$0xf0]  ;;  %v2063_v8 = vor.u32 %v2670_v5, %v2062_v3  ;;  %s1806_s3 = sshll.u32 %s2956_s2, 4  ;;  %s1808_s18 = sshll.u32 %s3065_s5, 4  ;;  %s1807_s3 = int_to_ptr.vmem [resolvable:$true] %s1806_s3  ;;  %s1809_s18 = int_to_ptr.hbm [resolvable:$true] %s1808_s18 }
  0x1b   :  { %v2191_v9 = vor.u32 %v2702_v7, %v2190_v6  ;;  %v2318_v10 = vld [vmem:[#allocation6 + $0x3e0] sm:$0xf]  ;;  %v2734_v11 = vld [vmem:[#allocation6 + $0x3ec] sm:$0xf0]  ;;  %1325 = vmatpush.bf16.msra.mxu0 %v1935_v4  ;;  %vm1799_vm5 = vcmask 57344  }
  0x1c   :  { %v1918_v12 = vld [vmem:[#allocation6 + $0xc0] sm:$0xf]  ;;  %v2319_v13 = vor.u32 %v2734_v11, %v2318_v10  ;;  %v2634_v14 = vld [vmem:[#allocation6 + $0xcc] sm:$0xf0]  ;;  %1338 = vmatpush.bf16.msra.mxu1 %v2063_v8 }
  0x1d   :  { %v2046_v15 = vld [vmem:[#allocation6 + $0x1c0] sm:$0xf]  ;;  %v2666_v16 = vld [vmem:[#allocation6 + $0x1cc] sm:$0xf0]  ;;  %1351 = vmatpush.bf16.msra.mxu2 %v2191_v9  ;;  %v1919_v17 = vor.u32 %v2634_v14, %v1918_v12 }
  0x1e   :  { %v2047_v18 = vor.u32 %v2666_v16, %v2046_v15  ;;  %v2174_v19 = vld [vmem:[#allocation6 + $0x2c0] sm:$0xf]  ;;  %v2698_v20 = vld [vmem:[#allocation6 + $0x2cc] sm:$0xf0]  ;;  %1364 = vmatpush.bf16.msra.mxu3 %v2319_v13 }
  0x1f   :  { %v2302_v21 = vld [vmem:[#allocation6 + $0x3c0] sm:$0xf]  ;;  %v2175_v22 = vor.u32 %v2698_v20, %v2174_v19  ;;  %v2730_v23 = vld [vmem:[#allocation6 + $0x3cc] sm:$0xf0]  ;;  %1326 = vmatpush.bf16.msra.mxu0 %v1919_v17 }
  0x20   :  { %v1902_v24 = vld [vmem:[#allocation6 + $0xa0] sm:$0xf]  ;;  %v2630_v25 = vld [vmem:[#allocation6 + $0xac] sm:$0xf0]  ;;  %v2303_v26 = vor.u32 %v2730_v23, %v2302_v21  ;;  %1339 = vmatpush.bf16.msra.mxu1 %v2047_v18 }
  0x21   :  { %v2030_v27 = vld [vmem:[#allocation6 + $0x1a0] sm:$0xf]  ;;  %v2662_v28 = vld [vmem:[#allocation6 + $0x1ac] sm:$0xf0]  ;;  %v1903_v30 = vor.u32 %v2630_v25, %v1902_v24  ;;  %1352 = vmatpush.bf16.msra.mxu2 %v2175_v22  ;;  %v83_v24 = vld [vmem:[#allocation3] sm:$0xff] }
  0x22   :  { %v2158_v29 = vld [vmem:[#allocation6 + $0x2a0] sm:$0xf]  ;;  %v2694_v31 = vld [vmem:[#allocation6 + $0x2ac] sm:$0xf0]  ;;  %v2031_v34 = vor.u32 %v2662_v28, %v2030_v27  ;;  %1365 = vmatpush.bf16.msra.mxu3 %v2303_v26  ;;  %v85_v25 = vld [vmem:[#allocation3 + $0xe] sm:$0xff] }
  0x23   :  { %v2286_v32 = vld [vmem:[#allocation6 + $0x3a0] sm:$0xf]  ;;  %v2726_v33 = vld [vmem:[#allocation6 + $0x3ac] sm:$0xf0]  ;;  %v2159_v35 = vor.u32 %v2694_v31, %v2158_v29  ;;  %1327 = vmatpush.bf16.msra.mxu0 %v1903_v30  ;;  %v87_v30 = vld [vmem:[#allocation3 + $0x1c] sm:$0xff] }
  0x24   :  { %v1886_v36 = vld [vmem:[#allocation6 + $0x80] sm:$0xf]  ;;  %v2626_v37 = vld [vmem:[#allocation6 + $0x8c] sm:$0xf0]  ;;  %v2287_v39 = vor.u32 %v2726_v33, %v2286_v32  ;;  %1340 = vmatpush.bf16.msra.mxu1 %v2031_v34  ;;  %99 = vst [vmem:[#allocation1] ss:$4 sm:$0xff] %v83_v24 }
  0x25   :  { %v2014_v38 = vld [vmem:[#allocation6 + $0x180] sm:$0xf]  ;;  %v2658_v40 = vld [vmem:[#allocation6 + $0x18c] sm:$0xf0]  ;;  %v1887_v45 = vor.u32 %v2626_v37, %v1886_v36  ;;  %1353 = vmatpush.bf16.msra.mxu2 %v2159_v35  ;;  %101 = vst [vmem:[#allocation1 + $0x1] ss:$4 sm:$0xff] %v85_v25 }
  0x26   :  { %v2142_v41 = vld [vmem:[#allocation6 + $0x280] sm:$0xf]  ;;  %v2690_v42 = vld [vmem:[#allocation6 + $0x28c] sm:$0xf0]  ;;  %v2015_v46 = vor.u32 %v2658_v40, %v2014_v38  ;;  %1366 = vmatpush.bf16.msra.mxu3 %v2287_v39  ;;  %103 = vst [vmem:[#allocation1 + $0x2] ss:$4 sm:$0xff] %v87_v30 }
  0x27   :  { %v2270_v43 = vld [vmem:[#allocation6 + $0x380] sm:$0xf]  ;;  %v2722_v44 = vld [vmem:[#allocation6 + $0x38c] sm:$0xf0]  ;;  %v2143_v47 = vor.u32 %v2690_v42, %v2142_v41  ;;  %1328 = vmatpush.bf16.msra.mxu0 %v1887_v45  ;;  %v2636_v38 = vld [vmem:[#allocation6 + $0xe4] sm:$0xf] }
  0x28   :  { %v1870_v48 = vld [vmem:[#allocation6 + $0x60] sm:$0xf]  ;;  %v2622_v49 = vld [vmem:[#allocation6 + $0x6c] sm:$0xf0]  ;;  %v2271_v51 = vor.u32 %v2722_v44, %v2270_v43  ;;  %1341 = vmatpush.bf16.msra.mxu1 %v2015_v46  ;;  %v1936_v39 = vld [vmem:[#allocation6 + $0xf0] sm:$0xf0] }
  0x29   :  { %v1998_v50 = vld [vmem:[#allocation6 + $0x160] sm:$0xf]  ;;  %v2654_v52 = vld [vmem:[#allocation6 + $0x16c] sm:$0xf0]  ;;  %v1871_v57 = vor.u32 %v2622_v49, %v1870_v48  ;;  %1354 = vmatpush.bf16.msra.mxu2 %v2143_v47  ;;  %v1939_v47 = vor.u32 %v2636_v38, %v1936_v39  ;;  %v2668_v48 = vld [vmem:[#allocation6 + $0x1e4] sm:$0xf] }
  0x2a   :  { %v2126_v53 = vld [vmem:[#allocation6 + $0x260] sm:$0xf]  ;;  %v2686_v54 = vld [vmem:[#allocation6 + $0x26c] sm:$0xf0]  ;;  %v1999_v58 = vor.u32 %v2654_v52, %v1998_v50  ;;  %1367 = vmatpush.bf16.msra.mxu3 %v2271_v51  ;;  %v2064_v52 = vld [vmem:[#allocation6 + $0x1f0] sm:$0xf0] }
  0x2b   :  { %v2254_v55 = vld [vmem:[#allocation6 + $0x360] sm:$0xf]  ;;  %v2718_v56 = vld [vmem:[#allocation6 + $0x36c] sm:$0xf0]  ;;  %v2127_v59 = vor.u32 %v2686_v54, %v2126_v53  ;;  %1329 = vmatpush.bf16.msra.mxu0 %v1871_v57  ;;  %v1888_v24 = vld [vmem:[#allocation6 + $0x90] sm:$0xf0] }
  0x2c   :  { %v1854_v60 = vld [vmem:[#allocation6 + $0x40] sm:$0xf]  ;;  %v2618_v61 = vld [vmem:[#allocation6 + $0x4c] sm:$0xf0]  ;;  %v2255_v63 = vor.u32 %v2718_v56, %v2254_v55  ;;  %1342 = vmatpush.bf16.msra.mxu1 %v1999_v58  ;;  %v2632_v55 = vld [vmem:[#allocation6 + $0xc4] sm:$0xf] }
  0x2d   :  { %v1982_v62 = vld [vmem:[#allocation6 + $0x140] sm:$0xf]  ;;  %v2650_v0 = vld [vmem:[#allocation6 + $0x14c] sm:$0xf0]  ;;  %v1855_v5 = vor.u32 %v2618_v61, %v1854_v60  ;;  %1355 = vmatpush.bf16.msra.mxu2 %v2127_v59  ;;  %v1920_v56 = vld [vmem:[#allocation6 + $0xd0] sm:$0xf0] }
  0x2e   :  { %v2110_v1 = vld [vmem:[#allocation6 + $0x240] sm:$0xf]  ;;  %v2682_v2 = vld [vmem:[#allocation6 + $0x24c] sm:$0xf0]  ;;  %v1983_v7 = vor.u32 %v2650_v0, %v1982_v62  ;;  %1368 = vmatpush.bf16.msra.mxu3 %v2255_v63  ;;  %v2664_v59 = vld [vmem:[#allocation6 + $0x1c4] sm:$0xf] }
  0x2f   :  { %v2238_v3 = vld [vmem:[#allocation6 + $0x340] sm:$0xf]  ;;  %v2714_v4 = vld [vmem:[#allocation6 + $0x34c] sm:$0xf0]  ;;  %v2111_v8 = vor.u32 %v2682_v2, %v2110_v1  ;;  %1330 = vmatpush.bf16.msra.mxu0 %v1855_v5  ;;  %v2048_v60 = vld [vmem:[#allocation6 + $0x1d0] sm:$0xf0]  ;;  %v2067_v1 = vor.u32 %v2668_v48, %v2064_v52  ;;  %v1923_v5 = vor.u32 %v2632_v55, %v1920_v56 }
  0x30   :  { %v1838_v6 = vld [vmem:[#allocation6 + $0x20] sm:$0xf]  ;;  %v2614_v9 = vld [vmem:[#allocation6 + $0x2c] sm:$0xf0]  ;;  %v2239_v12 = vor.u32 %v2714_v4, %v2238_v3  ;;  %1343 = vmatpush.bf16.msra.mxu1 %v1983_v7  ;;  %v1856_v52 = vld [vmem:[#allocation6 + $0x50] sm:$0xf0] }
  0x31   :  { %v1966_v10 = vld [vmem:[#allocation6 + $0x120] sm:$0xf]  ;;  %v2646_v11 = vld [vmem:[#allocation6 + $0x12c] sm:$0xf0]  ;;  %v1839_v19 = vor.u32 %v2614_v9, %v1838_v6  ;;  %1356 = vmatpush.bf16.msra.mxu2 %v2111_v8  ;;  %v2648_v56 = vld [vmem:[#allocation6 + $0x144] sm:$0xf] }
  0x32   :  { %v2094_v13 = vld [vmem:[#allocation6 + $0x220] sm:$0xf]  ;;  %v2678_v14 = vld [vmem:[#allocation6 + $0x22c] sm:$0xf0]  ;;  %v1967_v26 = vor.u32 %v2646_v11, %v1966_v10  ;;  %1369 = vmatpush.bf16.msra.mxu3 %v2239_v12  ;;  %v2628_v10 = vld [vmem:[#allocation6 + $0xa4] sm:$0xf] }
  0x33   :  { %v2222_v15 = vld [vmem:[#allocation6 + $0x320] sm:$0xf]  ;;  %v2710_v16 = vld [vmem:[#allocation6 + $0x32c] sm:$0xf0]  ;;  %v2095_v27 = vor.u32 %v2678_v14, %v2094_v13  ;;  %1331 = vmatpush.bf16.msra.mxu0 %v1839_v19  ;;  %v1904_v11 = vld [vmem:[#allocation6 + $0xb0] sm:$0xf0]  ;;  %v2051_v14 = vor.u32 %v2664_v59, %v2048_v60 }
  0x34   :  { %v1822_v17 = vld [vmem:[#allocation6] sm:$0xf]  ;;  %v2610_v18 = vld [vmem:[#allocation6 + $0xc] sm:$0xf0]  ;;  %v2223_v32 = vor.u32 %v2710_v16, %v2222_v15  ;;  %1344 = vmatpush.bf16.msra.mxu1 %v1967_v26  ;;  %v2660_v16 = vld [vmem:[#allocation6 + $0x1a4] sm:$0xf]  ;;  %v1907_v19 = vor.u32 %v2628_v10, %v1904_v11 }
  0x35   :  { %v1950_v20 = vld [vmem:[#allocation6 + $0x100] sm:$0xf]  ;;  %v2642_v21 = vld [vmem:[#allocation6 + $0x10c] sm:$0xf0]  ;;  %v1823_v37 = vor.u32 %v2610_v18, %v1822_v17  ;;  %1357 = vmatpush.bf16.msra.mxu2 %v2095_v27  ;;  %v2656_v26 = vld [vmem:[#allocation6 + $0x184] sm:$0xf] }
  0x36   :  { %v2078_v22 = vld [vmem:[#allocation6 + $0x200] sm:$0xf]  ;;  %v2674_v23 = vld [vmem:[#allocation6 + $0x20c] sm:$0xf0]  ;;  %v1951_v40 = vor.u32 %v2642_v21, %v1950_v20  ;;  %1370 = vmatpush.bf16.msra.mxu3 %v2223_v32  ;;  %v2032_v20 = vld [vmem:[#allocation6 + $0x1b0] sm:$0xf0] }
  0x37   :  { %v2206_v28 = vld [vmem:[#allocation6 + $0x300] sm:$0xf]  ;;  %v2706_v29 = vld [vmem:[#allocation6 + $0x30c] sm:$0xf0]  ;;  %v2079_v41 = vor.u32 %v2674_v23, %v2078_v22  ;;  %1332 = vmatpush.bf16.msra.mxu0 %v1823_v37  ;;  %v2624_v23 = vld [vmem:[#allocation6 + $0x84] sm:$0xf]  ;;  %v2035_v27 = vor.u32 %v2660_v16, %v2032_v20 }
  0x38   :  { %v89_v31 = vld [vmem:[#allocation3 + $0x2a] sm:$0xff]  ;;  %v2446_v33 = vld [vmem:[#allocation6 + $0x4e0] sm:$0xf]  ;;  %v2207_v44 = vor.u32 %v2706_v29, %v2206_v28  ;;  %1345 = vmatpush.bf16.msra.mxu1 %v1951_v40  ;;  %v1891_v32 = vor.u32 %v2624_v23, %v1888_v24  ;;  %v2652_v40 = vld [vmem:[#allocation6 + $0x164] sm:$0xf] }
  0x39   :  { %v2766_v34 = vld [vmem:[#allocation6 + $0x4ec] sm:$0xf0]  ;;  %v2574_v35 = vld [vmem:[#allocation6 + $0x5e0] sm:$0xf]  ;;  %105 = vst [vmem:[#allocation1 + $0x3] ss:$4 sm:$0xff] %v89_v31  ;;  %1358 = vmatpush.bf16.msra.mxu2 %v2079_v41 }
  0x3a   :  { %v2798_v36 = vld [vmem:[#allocation6 + $0x5ec] sm:$0xf0]  ;;  %v2590_v42 = vld [vmem:[#allocation6 + $0x600] sm:$0xf]  ;;  %v2447_v45 = vor.u32 %v2766_v34, %v2446_v33  ;;  %1371 = vmatpush.bf16.msra.mxu3 %v2207_v44  ;;  %v2016_v29 = vld [vmem:[#allocation6 + $0x190] sm:$0xf0] }
  0x3b   :  { %v2802_v43 = vld [vmem:[#allocation6 + $0x60c] sm:$0xf0]  ;;  %v2575_v46 = vor.u32 %v2798_v36, %v2574_v35  ;;  %v2430_v49 = vld [vmem:[#allocation6 + $0x4c0] sm:$0xf]  ;;  %v2620_v35 = vld [vmem:[#allocation6 + $0x64] sm:$0xf]  ;;  %v2019_v44 = vor.u32 %v2656_v26, %v2016_v29 }
  0x3c   :  { %v2762_v50 = vld [vmem:[#allocation6 + $0x4cc] sm:$0xf0]  ;;  %v2591_v51 = vor.u32 %v2802_v43, %v2590_v42  ;;  %v2558_v53 = vld [vmem:[#allocation6 + $0x5c0] sm:$0xf]  ;;  %1377 = vmatpush.bf16.msrb.mxu0 %v2447_v45  ;;  %v1872_v36 = vld [vmem:[#allocation6 + $0x70] sm:$0xf0] }
  0x3d   :  { %v2794_v54 = vld [vmem:[#allocation6 + $0x5cc] sm:$0xf0]  ;;  %v2414_v57 = vld [vmem:[#allocation6 + $0x4a0] sm:$0xf]  ;;  %v2431_v58 = vor.u32 %v2762_v50, %v2430_v49  ;;  %1390 = vmatpush.bf16.msrb.mxu1 %v2575_v46  ;;  %v2000_v41 = vld [vmem:[#allocation6 + $0x170] sm:$0xf0]  ;;  %v1875_v48 = vor.u32 %v2620_v35, %v1872_v36 }
  0x3e   :  { %v2758_v61 = vld [vmem:[#allocation6 + $0x4ac] sm:$0xf0]  ;;  %v2542_v62 = vld [vmem:[#allocation6 + $0x5a0] sm:$0xf]  ;;  %1416 = vmatpush.bf16.msrb.mxu3 %v1939_v47  ;;  %v2559_v2 = vor.u32 %v2794_v54, %v2558_v53  ;;  %1410 = vmatpush.bf16.msrb.mxu2 %v2591_v51  ;;  %v90_v43 = vld [vmem:[#allocation3 + $0x32] sm:$0x3f]  ;;  %v2003_v54 = vor.u32 %v2652_v40, %v2000_v41 }
  0x3f   :  { %v2790_v63 = vld [vmem:[#allocation6 + $0x5ac] sm:$0xf0]  ;;  %v2415_v13 = vor.u32 %v2758_v61, %v2414_v57  ;;  %v2398_v17 = vld [vmem:[#allocation6 + $0x480] sm:$0xf]  ;;  %v2616_v51 = vld [vmem:[#allocation6 + $0x44] sm:$0xf] }
  0x40   :  { %v116_v0 = vld.sshfl [vmem:[#allocation1 + $0x10] sm:$0xff pattern:$0x73625140]  ;;  %v114_v3 = vld.sshfl [vmem:[#allocation1] sm:$0xff pattern:$0x73625140]  ;;  %1378 = vmatpush.bf16.msrb.mxu0 %v2431_v58  ;;  %v2543_v15 = vor.u32 %v2790_v63, %v2542_v62  ;;  %v1859_v59 = vor.u32 %v2616_v51, %v1856_v52 }
  0x41   :  { %v3002_v4 = vpack.c.bf16 %v116_v0, %v116_v0  ;;  %v3004_v6 = vpack.c.bf16 %v114_v3, %v114_v3  ;;  %v117_v7 = vld.sshfl [vmem:[#allocation1 + $0x18] sm:$0xff pattern:$0x73625140]  ;;  %v115_v8 = vld.sshfl [vmem:[#allocation1 + $0x8] sm:$0xff pattern:$0x73625140]  ;;  %1391 = vmatpush.bf16.msrb.mxu1 %v2559_v2 }
  0x42   :  { %v3006_v9 = vpack.c.bf16 %v117_v7, %v117_v7  ;;  %v3008_v12 = vpack.c.bf16 %v115_v8, %v115_v8  ;;  %v2754_v18 = vld [vmem:[#allocation6 + $0x48c] sm:$0xf0]  ;;  %1417 = vmatpush.bf16.msrb.mxu3 %v1923_v5  ;;  %v2526_v21 = vld [vmem:[#allocation6 + $0x580] sm:$0xf]  ;;  %113 = vst [vmem:[#allocation1 + $0x23] ss:$4 sm:$0xff] %v90_v43 }
  0x43   :  { %1359 = vmatmul.bf16.vlgmr.msra.gmra.mxu2 %v3002_v4  ;;  %1333 = vmatmul.bf16.vlgmr.msra.gmra.mxu0 %v3004_v6  ;;  %v2786_v22 = vld [vmem:[#allocation6 + $0x58c] sm:$0xf0]  ;;  %v2399_v25 = vor.u32 %v2754_v18, %v2398_v17  ;;  %v2382_v30 = vld [vmem:[#allocation6 + $0x460] sm:$0xf]  ;;  %v1984_v60 = vld [vmem:[#allocation6 + $0x150] sm:$0xf0] }
  0x44   :  { %1429 = vmatpush.bf16.msra.mxu2 %v2067_v1  ;;  %1372 = vmatmul.bf16.vlgmr.msra.gmra.mxu3 %v3006_v9  ;;  %v2527_v28 = vor.u32 %v2786_v22, %v2526_v21  ;;  %v2750_v31 = vld [vmem:[#allocation6 + $0x46c] sm:$0xf0]  ;;  %v2510_v33 = vld [vmem:[#allocation6 + $0x560] sm:$0xf]  ;;  %v2612_v63 = vld [vmem:[#allocation6 + $0x24] sm:$0xf]  ;;  %v1987_v10 = vor.u32 %v2648_v56, %v1984_v60 }
  0x45   :  { %1346 = vmatmul.bf16.vlgmr.msra.gmra.mxu1 %v3008_v12  ;;  %1379 = vmatpush.bf16.msrb.mxu0 %v2415_v13  ;;  %v2782_v34 = vld [vmem:[#allocation6 + $0x56c] sm:$0xf0]  ;;  %v86_v38 = vld [vmem:[#allocation3 + $0x16] sm:$0x3f]  ;;  %v2383_v39 = vor.u32 %v2750_v31, %v2382_v30  ;;  %v1840_v0 = vld [vmem:[#allocation6 + $0x30] sm:$0xf0] }
  0x46   :  { %1392 = vmatpush.bf16.msrb.mxu1 %v2543_v15  ;;  %1418 = vmatpush.bf16.msrb.mxu3 %v1907_v19  ;;  %v84_v37 = vld [vmem:[#allocation3 + $0x8] sm:$0x3f]  ;;  %v2511_v45 = vor.u32 %v2782_v34, %v2510_v33  ;;  %v2366_v46 = vld [vmem:[#allocation6 + $0x440] sm:$0xf]  ;;  %109 = vst [vmem:[#allocation1 + $0x21] ss:$4 sm:$0xff] %v86_v38  ;;  %v1843_v16 = vor.u32 %v2612_v63, %v1840_v0 }
  0x47   :  { %v88_v42 = vld [vmem:[#allocation3 + $0x24] sm:$0x3f]  ;;  %107 = vst [vmem:[#allocation1 + $0x20] ss:$4 sm:$0xff] %v84_v37  ;;  %v2494_v49 = vld [vmem:[#allocation6 + $0x540] sm:$0xf] }
  0x48   :  { %1430 = vmatpush.bf16.msra.mxu2 %v2051_v14  ;;  %v2746_v47 = vld [vmem:[#allocation6 + $0x44c] sm:$0xf0]  ;;  %111 = vst [vmem:[#allocation1 + $0x22] ss:$4 sm:$0xff] %v88_v42  ;;  %v2350_v57 = vld [vmem:[#allocation6 + $0x420] sm:$0xf] }
  0x49   :  { %1380 = vmatpush.bf16.msrb.mxu0 %v2399_v25  ;;  %v2778_v50 = vld [vmem:[#allocation6 + $0x54c] sm:$0xf0]  ;;  %v2367_v53 = vor.u32 %v2746_v47, %v2366_v46  ;;  %v2478_v61 = vld [vmem:[#allocation6 + $0x520] sm:$0xf]  ;;  %v2644_v2 = vld [vmem:[#allocation6 + $0x124] sm:$0xf] }
  0x4a   :  { %1393 = vmatpush.bf16.msrb.mxu1 %v2527_v28  ;;  %1419 = vmatpush.bf16.msrb.mxu3 %v1891_v32  ;;  %v2495_v55 = vor.u32 %v2778_v50, %v2494_v49  ;;  %v2742_v58 = vld [vmem:[#allocation6 + $0x42c] sm:$0xf0]  ;;  %v1968_v3 = vld [vmem:[#allocation6 + $0x130] sm:$0xf0]  ;;  %v2334_v5 = vld [vmem:[#allocation6 + $0x400] sm:$0xf] }
  0x4b   :  { %v2774_v62 = vld [vmem:[#allocation6 + $0x52c] sm:$0xf0]  ;;  %v2351_v1 = vor.u32 %v2742_v58, %v2350_v57  ;;  %v2462_v8 = vld [vmem:[#allocation6 + $0x500] sm:$0xf]  ;;  %v2608_v14 = vld [vmem:[#allocation6 + $0x4] sm:$0xf] }
  0x4c   :  { %1431 = vmatpush.bf16.msra.mxu2 %v2035_v27  ;;  %v2738_v7 = vld [vmem:[#allocation6 + $0x40c] sm:$0xf0]  ;;  %v2479_v11 = vor.u32 %v2774_v62, %v2478_v61  ;;  %v1824_v15 = vld [vmem:[#allocation6 + $0x10] sm:$0xf0]  ;;  %v2700_v18 = vld [vmem:[#allocation6 + $0x2e4] sm:$0xf]  ;;  %v1971_v27 = vor.u32 %v2644_v2, %v1968_v3 }
  0x4d   :  { %1381 = vmatpush.bf16.msrb.mxu0 %v2383_v39  ;;  %v2770_v13 = vld [vmem:[#allocation6 + $0x50c] sm:$0xf0]  ;;  %v2192_v20 = vld [vmem:[#allocation6 + $0x2f0] sm:$0xf0]  ;;  %v2732_v21 = vld [vmem:[#allocation6 + $0x3e4] sm:$0xf]  ;;  %v2335_v23 = vor.u32 %v2738_v7, %v2334_v5  ;;  %v1827_v31 = vor.u32 %v2608_v14, %v1824_v15 }
  0x4e   :  { %1394 = vmatpush.bf16.msrb.mxu1 %v2511_v45  ;;  %1420 = vmatpush.bf16.msrb.mxu3 %v1875_v48  ;;  %v2320_v22 = vld [vmem:[#allocation6 + $0x3f0] sm:$0xf0]  ;;  %v2764_v24 = vld [vmem:[#allocation6 + $0x4e4] sm:$0xf]  ;;  %v2463_v28 = vor.u32 %v2770_v13, %v2462_v8  ;;  %v2195_v32 = vor.u32 %v2700_v18, %v2192_v20 }
  0x4f   :  { %v120_v17 = vld.sshfl [vmem:[#allocation1 + $0x30] sm:$0xff pattern:$0x73625140]  ;;  %v2640_v26 = vld [vmem:[#allocation6 + $0x104] sm:$0xf]  ;;  %v2323_v36 = vor.u32 %v2732_v21, %v2320_v22 }
  0x50   :  { %1432 = vmatpush.bf16.msra.mxu2 %v2019_v44  ;;  %v3014_v19 = vpack.c.bf16 %v120_v17, %v120_v17  ;;  %v2448_v25 = vld [vmem:[#allocation6 + $0x4f0] sm:$0xf0]  ;;  %v118_v29 = vld.sshfl [vmem:[#allocation1 + $0x20] sm:$0xff pattern:$0x73625140] }
  0x51   :  { %1382 = vmatpush.bf16.msrb.mxu0 %v2367_v53  ;;  %v119_v30 = vld.sshfl [vmem:[#allocation1 + $0x28] sm:$0xff pattern:$0x73625140]  ;;  %v1952_v33 = vld [vmem:[#allocation6 + $0x110] sm:$0xf0]  ;;  %v2451_v37 = vor.u32 %v2764_v24, %v2448_v25  ;;  %v3018_v41 = vpack.c.bf16 %v118_v29, %v118_v29 }
  0x52   :  { %1395 = vmatpush.bf16.msrb.mxu1 %v2495_v55  ;;  %1421 = vmatpush.bf16.msrb.mxu3 %v1859_v59  ;;  %v2796_v34 = vld [vmem:[#allocation6 + $0x5e4] sm:$0xf]  ;;  %v2576_v35 = vld [vmem:[#allocation6 + $0x5f0] sm:$0xf0]  ;;  %v3020_v42 = vpack.c.bf16 %v119_v30, %v119_v30  ;;  %v1955_v46 = vor.u32 %v2640_v26, %v1952_v33 }
  0x53   :  { %2604 = vmatmul.msk.bf16.vlgmr.msrb.gmra.mxu2 %vm1321_vm0, %v3014_v19  ;;  %v2696_v38 = vld [vmem:[#allocation6 + $0x2c4] sm:$0xf]  ;;  %v2176_v39 = vld [vmem:[#allocation6 + $0x2d0] sm:$0xf0]  ;;  %v2579_v47 = vor.u32 %v2796_v34, %v2576_v35 }
  0x54   :  { %1433 = vmatpush.bf16.msra.mxu2 %v2003_v54  ;;  %v2728_v40 = vld [vmem:[#allocation6 + $0x3c4] sm:$0xf]  ;;  %v2304_v43 = vld [vmem:[#allocation6 + $0x3d0] sm:$0xf0]  ;;  %v2179_v48 = vor.u32 %v2696_v38, %v2176_v39 }
  0x55   :  { %1383 = vmatpush.bf16.msrb.mxu0 %v2351_v1  ;;  %v2760_v44 = vld [vmem:[#allocation6 + $0x4c4] sm:$0xf]  ;;  %v2432_v45 = vld [vmem:[#allocation6 + $0x4d0] sm:$0xf0]  ;;  %v2307_v51 = vor.u32 %v2728_v40, %v2304_v43 }
  0x56   :  { %1396 = vmatpush.bf16.msrb.mxu1 %v2479_v11  ;;  %1422 = vmatpush.bf16.msrb.mxu3 %v1843_v16  ;;  %v2792_v49 = vld [vmem:[#allocation6 + $0x5c4] sm:$0xf]  ;;  %v2560_v50 = vld [vmem:[#allocation6 + $0x5d0] sm:$0xf0]  ;;  %v2435_v52 = vor.u32 %v2760_v44, %v2432_v45 }
  0x57   :  { %v2692_v53 = vld [vmem:[#allocation6 + $0x2a4] sm:$0xf]  ;;  %v2160_v54 = vld [vmem:[#allocation6 + $0x2b0] sm:$0xf0]  ;;  %v2563_v59 = vor.u32 %v2792_v49, %v2560_v50 }
  0x58   :  { %1434 = vmatpush.bf16.msra.mxu2 %v1987_v10  ;;  %v2724_v55 = vld [vmem:[#allocation6 + $0x3a4] sm:$0xf]  ;;  %v2288_v56 = vld [vmem:[#allocation6 + $0x3b0] sm:$0xf0]  ;;  %v2163_v60 = vor.u32 %v2692_v53, %v2160_v54 }
  0x59   :  { %1384 = vmatpush.bf16.msrb.mxu0 %v2335_v23  ;;  %v2756_v57 = vld [vmem:[#allocation6 + $0x4a4] sm:$0xf]  ;;  %v2416_v58 = vld [vmem:[#allocation6 + $0x4b0] sm:$0xf0]  ;;  %v2291_v63 = vor.u32 %v2724_v55, %v2288_v56 }
  0x5a   :  { %1397 = vmatpush.bf16.msrb.mxu1 %v2463_v28  ;;  %1423 = vmatpush.bf16.msrb.mxu3 %v1827_v31  ;;  %v2788_v61 = vld [vmem:[#allocation6 + $0x5a4] sm:$0xf]  ;;  %v2544_v62 = vld [vmem:[#allocation6 + $0x5b0] sm:$0xf0]  ;;  %v2419_v0 = vor.u32 %v2756_v57, %v2416_v58 }
  0x5b   :  { %v2688_v1 = vld [vmem:[#allocation6 + $0x284] sm:$0xf]  ;;  %v2144_v2 = vld [vmem:[#allocation6 + $0x290] sm:$0xf0]  ;;  %v2547_v10 = vor.u32 %v2788_v61, %v2544_v62  ;;  %v1942_v62 = vld [vmem:[#allocation6 + $0xe8] sm:$0xf] }
  0x5c   :  { %1435 = vmatpush.bf16.msra.mxu2 %v1971_v27  ;;  %1385 = vmatmul.bf16.vlgmr.msrb.gmra.mxu0 %v3018_v41  ;;  %v2720_v3 = vld [vmem:[#allocation6 + $0x384] sm:$0xf]  ;;  %v2272_v5 = vld [vmem:[#allocation6 + $0x390] sm:$0xf0]  ;;  %v2147_v11 = vor.u32 %v2688_v1, %v2144_v2  ;;  %v2671_v1 = vld [vmem:[#allocation6 + $0x1f4] sm:$0xf0] }
  0x5d   :  { %1442 = vmatpush.bf16.msra.mxu0 %v2195_v32  ;;  %1398 = vmatmul.bf16.vlgmr.msrb.gmra.mxu1 %v3020_v42  ;;  %v2752_v7 = vld [vmem:[#allocation6 + $0x484] sm:$0xf]  ;;  %v2400_v8 = vld [vmem:[#allocation6 + $0x490] sm:$0xf0]  ;;  %v2275_v15 = vor.u32 %v2720_v3, %v2272_v5 }
  0x5e   :  { %1455 = vmatpush.bf16.msra.mxu1 %v2323_v36  ;;  %1468 = vmatpush.bf16.msra.mxu3 %v2451_v37  ;;  %v2784_v13 = vld [vmem:[#allocation6 + $0x584] sm:$0xf]  ;;  %v2528_v14 = vld [vmem:[#allocation6 + $0x590] sm:$0xf0]  ;;  %v2403_v16 = vor.u32 %v2752_v7, %v2400_v8 }
  0x5f   :  { %1424 = vmatmul.bf16.vlgmr.msrb.gmra.mxu3 %v3004_v6  ;;  %v2684_v17 = vld [vmem:[#allocation6 + $0x264] sm:$0xf]  ;;  %v2128_v18 = vld [vmem:[#allocation6 + $0x270] sm:$0xf0]  ;;  %v2531_v24 = vor.u32 %v2784_v13, %v2528_v14  ;;  %v2198_v14 = vld [vmem:[#allocation6 + $0x2e8] sm:$0xf] }
  0x60   :  { %1436 = vmatpush.bf16.msra.mxu2 %v1955_v46  ;;  %v2716_v20 = vld [vmem:[#allocation6 + $0x364] sm:$0xf]  ;;  %v2256_v21 = vld [vmem:[#allocation6 + $0x370] sm:$0xf0]  ;;  %v2131_v25 = vor.u32 %v2684_v17, %v2128_v18  ;;  %v2326_v18 = vld [vmem:[#allocation6 + $0x3e8] sm:$0xf] }
  0x61   :  { %1443 = vmatpush.bf16.msra.mxu0 %v2179_v48  ;;  %v2748_v22 = vld [vmem:[#allocation6 + $0x464] sm:$0xf]  ;;  %v2384_v23 = vld [vmem:[#allocation6 + $0x470] sm:$0xf0]  ;;  %v2259_v28 = vor.u32 %v2716_v20, %v2256_v21  ;;  %v2735_v20 = vld [vmem:[#allocation6 + $0x3f4] sm:$0xf0] }
  0x62   :  { %1456 = vmatpush.bf16.msra.mxu1 %v2307_v51  ;;  %1469 = vmatpush.bf16.msra.mxu3 %v2435_v52  ;;  %v2780_v26 = vld [vmem:[#allocation6 + $0x564] sm:$0xf]  ;;  %v2512_v27 = vld [vmem:[#allocation6 + $0x570] sm:$0xf0]  ;;  %v2387_v29 = vor.u32 %v2748_v22, %v2384_v23  ;;  %v1926_v21 = vld [vmem:[#allocation6 + $0xc8] sm:$0xf] }
  0x63   :  { %v2680_v30 = vld [vmem:[#allocation6 + $0x244] sm:$0xf]  ;;  %v2112_v31 = vld [vmem:[#allocation6 + $0x250] sm:$0xf0]  ;;  %1437 = vmatmul.bf16.vlgmr.msra.gmra.mxu2 %v3008_v12  ;;  %v2515_v36 = vor.u32 %v2780_v26, %v2512_v27  ;;  %v2635_v22 = vld [vmem:[#allocation6 + $0xd4] sm:$0xf0] }
  0x64   :  { %1481 = vmatpush.bf16.msrb.mxu2 %v2579_v47  ;;  %v2712_v32 = vld [vmem:[#allocation6 + $0x344] sm:$0xf]  ;;  %v2240_v33 = vld [vmem:[#allocation6 + $0x350] sm:$0xf0]  ;;  %v2115_v37 = vor.u32 %v2680_v30, %v2112_v31  ;;  %v2054_v23 = vld [vmem:[#allocation6 + $0x1c8] sm:$0xf]  ;;  %v1927_v31 = vor.u32 %v2635_v22, %v1926_v21 }
  0x65   :  { %1444 = vmatpush.bf16.msra.mxu0 %v2163_v60  ;;  %v2744_v34 = vld [vmem:[#allocation6 + $0x444] sm:$0xf]  ;;  %v2368_v35 = vld [vmem:[#allocation6 + $0x450] sm:$0xf0]  ;;  %v2243_v40 = vor.u32 %v2712_v32, %v2240_v33  ;;  %v2699_v30 = vld [vmem:[#allocation6 + $0x2d4] sm:$0xf0] }
  0x66   :  { %1457 = vmatpush.bf16.msra.mxu1 %v2291_v63  ;;  %1470 = vmatpush.bf16.msra.mxu3 %v2419_v0  ;;  %v2776_v38 = vld [vmem:[#allocation6 + $0x544] sm:$0xf]  ;;  %v2496_v39 = vld [vmem:[#allocation6 + $0x550] sm:$0xf0]  ;;  %v2371_v43 = vor.u32 %v2744_v34, %v2368_v35  ;;  %v2639_v63 = vld [vmem:[#allocation6 + $0xf4] sm:$0xf0] }
  0x67   :  { %v2676_v44 = vld [vmem:[#allocation6 + $0x224] sm:$0xf]  ;;  %v2096_v45 = vld [vmem:[#allocation6 + $0x230] sm:$0xf0]  ;;  %v2499_v50 = vor.u32 %v2776_v38, %v2496_v39  ;;  %v2070_v0 = vld [vmem:[#allocation6 + $0x1e8] sm:$0xf] }
  0x68   :  { %1482 = vmatpush.bf16.msrb.mxu2 %v2563_v59  ;;  %v2708_v46 = vld [vmem:[#allocation6 + $0x324] sm:$0xf]  ;;  %v2224_v47 = vld [vmem:[#allocation6 + $0x330] sm:$0xf0]  ;;  %v2099_v51 = vor.u32 %v2676_v44, %v2096_v45  ;;  %v2071_v17 = vor.u32 %v2671_v1, %v2070_v0  ;;  %v2310_v33 = vld [vmem:[#allocation6 + $0x3c8] sm:$0xf] }
  0x69   :  { %1445 = vmatpush.bf16.msra.mxu0 %v2147_v11  ;;  %v2740_v48 = vld [vmem:[#allocation6 + $0x424] sm:$0xf]  ;;  %v2352_v49 = vld [vmem:[#allocation6 + $0x430] sm:$0xf0]  ;;  %v2227_v55 = vor.u32 %v2708_v46, %v2224_v47  ;;  %v2731_v34 = vld [vmem:[#allocation6 + $0x3d4] sm:$0xf0] }
  0x6a   :  { %1458 = vmatpush.bf16.msra.mxu1 %v2275_v15  ;;  %1471 = vmatpush.bf16.msra.mxu3 %v2403_v16  ;;  %v2772_v52 = vld [vmem:[#allocation6 + $0x524] sm:$0xf]  ;;  %v2480_v53 = vld [vmem:[#allocation6 + $0x530] sm:$0xf0]  ;;  %v2355_v56 = vor.u32 %v2740_v48, %v2352_v49  ;;  %v2703_v15 = vld [vmem:[#allocation6 + $0x2f4] sm:$0xf0]  ;;  %v1943_v16 = vor.u32 %v2639_v63, %v1942_v62 }
  0x6b   :  { %v2672_v54 = vld [vmem:[#allocation6 + $0x204] sm:$0xf]  ;;  %v2080_v57 = vld [vmem:[#allocation6 + $0x210] sm:$0xf0]  ;;  %v2483_v2 = vor.u32 %v2772_v52, %v2480_v53  ;;  %v2199_v27 = vor.u32 %v2703_v15, %v2198_v14  ;;  %v1910_v35 = vld [vmem:[#allocation6 + $0xa8] sm:$0xf] }
  0x6c   :  { %1483 = vmatpush.bf16.msrb.mxu2 %v2547_v10  ;;  %v2704_v58 = vld [vmem:[#allocation6 + $0x304] sm:$0xf]  ;;  %v2208_v59 = vld [vmem:[#allocation6 + $0x310] sm:$0xf0]  ;;  %v2083_v3 = vor.u32 %v2672_v54, %v2080_v57  ;;  %v2663_v38 = vld [vmem:[#allocation6 + $0x1b4] sm:$0xf0] }
  0x6d   :  { %1446 = vmatpush.bf16.msra.mxu0 %v2131_v25  ;;  %v2736_v60 = vld [vmem:[#allocation6 + $0x404] sm:$0xf]  ;;  %v2336_v61 = vld [vmem:[#allocation6 + $0x410] sm:$0xf0]  ;;  %v2211_v10 = vor.u32 %v2704_v58, %v2208_v59  ;;  %v2695_v44 = vld [vmem:[#allocation6 + $0x2b4] sm:$0xf0] }
  0x6e   :  { %1459 = vmatpush.bf16.msra.mxu1 %v2259_v28  ;;  %1472 = vmatpush.bf16.msra.mxu3 %v2387_v29  ;;  %v2768_v5 = vld [vmem:[#allocation6 + $0x504] sm:$0xf]  ;;  %v2464_v7 = vld [vmem:[#allocation6 + $0x510] sm:$0xf0]  ;;  %v2339_v11 = vor.u32 %v2736_v60, %v2336_v61  ;;  %v2327_v28 = vor.u32 %v2735_v20, %v2326_v18  ;;  %v2182_v29 = vld [vmem:[#allocation6 + $0x2c8] sm:$0xf] }
  0x6f   :  { %v2800_v8 = vld [vmem:[#allocation6 + $0x604] sm:$0xf]  ;;  %v2592_v13 = vld [vmem:[#allocation6 + $0x610] sm:$0xf0]  ;;  %v2467_v25 = vor.u32 %v2768_v5, %v2464_v7  ;;  %v2183_v39 = vor.u32 %v2699_v30, %v2182_v29  ;;  %v2294_v47 = vld [vmem:[#allocation6 + $0x3a8] sm:$0xf] }
  0x70   :  { %1484 = vmatpush.bf16.msrb.mxu2 %v2531_v24  ;;  %v2667_v24 = vld [vmem:[#allocation6 + $0x1d4] sm:$0xf0]  ;;  %v2595_v26 = vor.u32 %v2800_v8, %v2592_v13  ;;  %v1894_v49 = vld [vmem:[#allocation6 + $0x88] sm:$0xf] }
  0x71   :  { %1447 = vmatpush.bf16.msra.mxu0 %v2115_v37  ;;  %v2055_v32 = vor.u32 %v2667_v24, %v2054_v23  ;;  %v2038_v37 = vld [vmem:[#allocation6 + $0x1a8] sm:$0xf]  ;;  %v2727_v48 = vld [vmem:[#allocation6 + $0x3b4] sm:$0xf0] }
  0x72   :  { %1460 = vmatpush.bf16.msra.mxu1 %v2243_v40  ;;  %1473 = vmatpush.bf16.msra.mxu3 %v2371_v43  ;;  %v2311_v40 = vor.u32 %v2731_v34, %v2310_v33  ;;  %v2166_v43 = vld [vmem:[#allocation6 + $0x2a8] sm:$0xf]  ;;  %v2039_v46 = vor.u32 %v2663_v38, %v2038_v37  ;;  %v2659_v52 = vld [vmem:[#allocation6 + $0x194] sm:$0xf0]  ;;  %v2295_v54 = vor.u32 %v2727_v48, %v2294_v47 }
  0x73   :  { %v2167_v53 = vor.u32 %v2695_v44, %v2166_v43  ;;  %v2278_v59 = vld [vmem:[#allocation6 + $0x388] sm:$0xf]  ;;  %v2723_v60 = vld [vmem:[#allocation6 + $0x394] sm:$0xf0] }
  0x74   :  { %1485 = vmatpush.bf16.msrb.mxu2 %v2515_v36  ;;  %v2631_v36 = vld [vmem:[#allocation6 + $0xb4] sm:$0xf0]  ;;  %v1878_v61 = vld [vmem:[#allocation6 + $0x68] sm:$0xf] }
  0x75   :  { %1448 = vmatpush.bf16.msra.mxu0 %v2099_v51  ;;  %v1911_v45 = vor.u32 %v2631_v36, %v1910_v35  ;;  %v2022_v51 = vld [vmem:[#allocation6 + $0x188] sm:$0xf]  ;;  %v2623_v62 = vld [vmem:[#allocation6 + $0x74] sm:$0xf0] }
  0x76   :  { %1461 = vmatpush.bf16.msra.mxu1 %v2227_v55  ;;  %1474 = vmatpush.bf16.msra.mxu3 %v2355_v56  ;;  %v2150_v55 = vld [vmem:[#allocation6 + $0x288] sm:$0xf]  ;;  %v2691_v56 = vld [vmem:[#allocation6 + $0x294] sm:$0xf0]  ;;  %v2023_v58 = vor.u32 %v2659_v52, %v2022_v51  ;;  %v1879_v7 = vor.u32 %v2623_v62, %v1878_v61 }
  0x77   :  { %v2006_v63 = vld [vmem:[#allocation6 + $0x168] sm:$0xf]  ;;  %v2655_v0 = vld [vmem:[#allocation6 + $0x174] sm:$0xf0]  ;;  %v2151_v1 = vor.u32 %v2691_v56, %v2150_v55  ;;  %v2637_v56 = vld [vmem:[#allocation6 + $0xec] sm:$0xf] }
  0x78   :  { %1486 = vmatpush.bf16.msrb.mxu2 %v2499_v50  ;;  %v2627_v50 = vld [vmem:[#allocation6 + $0x94] sm:$0xf0]  ;;  %v2007_v8 = vor.u32 %v2655_v0, %v2006_v63  ;;  %v1862_v13 = vld [vmem:[#allocation6 + $0x48] sm:$0xf] }
  0x79   :  { %1449 = vmatpush.bf16.msra.mxu0 %v2083_v3  ;;  %v1895_v57 = vor.u32 %v2627_v50, %v1894_v49  ;;  %v2134_v3 = vld [vmem:[#allocation6 + $0x268] sm:$0xf]  ;;  %v2687_v5 = vld [vmem:[#allocation6 + $0x274] sm:$0xf0] }
  0x7a   :  { %1462 = vmatpush.bf16.msra.mxu1 %v2211_v10  ;;  %1475 = vmatpush.bf16.msra.mxu3 %v2339_v11  ;;  %v2262_v10 = vld [vmem:[#allocation6 + $0x368] sm:$0xf]  ;;  %v2719_v11 = vld [vmem:[#allocation6 + $0x374] sm:$0xf0] }
  0x7b   :  { %v2619_v14 = vld [vmem:[#allocation6 + $0x54] sm:$0xf0]  ;;  %v1990_v15 = vld [vmem:[#allocation6 + $0x148] sm:$0xf]  ;;  %v2263_v18 = vor.u32 %v2719_v11, %v2262_v10  ;;  %v2072_v10 = vld [vmem:[#allocation6 + $0x1f8] sm:$0xf0] }
  0x7c   :  { %1487 = vmatpush.bf16.msrb.mxu2 %v2483_v2  ;;  %1450 = vmatmul.bf16.vlgmr.msra.gmra.mxu0 %v3002_v4  ;;  %v2279_v2 = vor.u32 %v2723_v60, %v2278_v59  ;;  %v2118_v20 = vld [vmem:[#allocation6 + $0x248] sm:$0xf]  ;;  %v2683_v21 = vld [vmem:[#allocation6 + $0x254] sm:$0xf0]  ;;  %v1863_v22 = vor.u32 %v2619_v14, %v1862_v13  ;;  %v2633_v14 = vld [vmem:[#allocation6 + $0xcc] sm:$0xf] }
  0x7d   :  { %1501 = vmatpush.bf16.msrb.mxu0 %v2595_v26  ;;  %1476 = vmatmul.bf16.vlgmr.msra.gmra.mxu3 %v3018_v41  ;;  %v2246_v24 = vld [vmem:[#allocation6 + $0x348] sm:$0xf]  ;;  %v2647_v29 = vld [vmem:[#allocation6 + $0x134] sm:$0xf0]  ;;  %v2119_v30 = vor.u32 %v2683_v21, %v2118_v20 }
  0x7e   :  { %1507 = vmatpush.bf16.msrb.mxu1 %v1943_v16  ;;  %1520 = vmatpush.bf16.msrb.mxu3 %v2071_v17  ;;  %v2651_v16 = vld [vmem:[#allocation6 + $0x154] sm:$0xf0]  ;;  %v2135_v17 = vor.u32 %v2687_v5, %v2134_v3  ;;  %v1846_v26 = vld [vmem:[#allocation6 + $0x28] sm:$0xf] }
  0x7f   :  { %1463 = vmatmul.bf16.vlgmr.msra.gmra.mxu1 %v3006_v9  ;;  %v1991_v23 = vor.u32 %v2651_v16, %v1990_v15  ;;  %v2679_v33 = vld [vmem:[#allocation6 + $0x234] sm:$0xf0]  ;;  %v2230_v34 = vld [vmem:[#allocation6 + $0x328] sm:$0xf]  ;;  %v1928_v15 = vld [vmem:[#allocation6 + $0xd8] sm:$0xf0] }
  0x80   :  { %1488 = vmatpush.bf16.msrb.mxu2 %v2467_v25  ;;  %v2715_v25 = vld [vmem:[#allocation6 + $0x354] sm:$0xf0]  ;;  %v1830_v38 = vld [vmem:[#allocation6 + $0x8] sm:$0xf] }
  0x81   :  { %1533 = vmatpush.bf16.msra.mxu0 %v2199_v27  ;;  %v2615_v27 = vld [vmem:[#allocation6 + $0x34] sm:$0xf0]  ;;  %v2454_v44 = vld [vmem:[#allocation6 + $0x4e8] sm:$0xf] }
  0x82   :  { %1508 = vmatpush.bf16.msrb.mxu1 %v1927_v31  ;;  %1521 = vmatpush.bf16.msrb.mxu3 %v2055_v32  ;;  %v2247_v31 = vor.u32 %v2715_v25, %v2246_v24  ;;  %v2102_v32 = vld [vmem:[#allocation6 + $0x228] sm:$0xf]  ;;  %v1847_v35 = vor.u32 %v2615_v27, %v1846_v26  ;;  %v2711_v37 = vld [vmem:[#allocation6 + $0x334] sm:$0xf0]  ;;  %v2056_v24 = vld [vmem:[#allocation6 + $0x1d8] sm:$0xf0] }
  0x83   :  { %1489 = vmatmul.bf16.vlgmr.msrb.gmra.mxu2 %v3020_v42  ;;  %v2643_v43 = vld [vmem:[#allocation6 + $0x114] sm:$0xf0]  ;;  %v2103_v48 = vor.u32 %v2679_v33, %v2102_v32  ;;  %v2231_v49 = vor.u32 %v2711_v37, %v2230_v34  ;;  %v2086_v50 = vld [vmem:[#allocation6 + $0x208] sm:$0xf]  ;;  %v2629_v27 = vld [vmem:[#allocation6 + $0xac] sm:$0xf] }
  0x84   :  { %1546 = vmatpush.bf16.msra.mxu2 %v2327_v28  ;;  %v1974_v28 = vld [vmem:[#allocation6 + $0x128] sm:$0xf]  ;;  %v2799_v47 = vld [vmem:[#allocation6 + $0x5f4] sm:$0xf0] }
  0x85   :  { %1534 = vmatpush.bf16.msra.mxu0 %v2183_v39  ;;  %v1975_v36 = vor.u32 %v2647_v29, %v1974_v28  ;;  %v2611_v39 = vld [vmem:[#allocation6 + $0x14] sm:$0xf0]  ;;  %v2214_v52 = vld [vmem:[#allocation6 + $0x308] sm:$0xf]  ;;  %v1912_v28 = vld [vmem:[#allocation6 + $0xb8] sm:$0xf0] }
  0x86   :  { %1509 = vmatpush.bf16.msrb.mxu1 %v1911_v45  ;;  %1522 = vmatpush.bf16.msrb.mxu3 %v2039_v46  ;;  %v2767_v45 = vld [vmem:[#allocation6 + $0x4f4] sm:$0xf0]  ;;  %v2582_v46 = vld [vmem:[#allocation6 + $0x5e8] sm:$0xf]  ;;  %v1915_v34 = vor.u32 %v2629_v27, %v1912_v28  ;;  %v2733_v27 = vld [vmem:[#allocation6 + $0x3ec] sm:$0xf] }
  0x87   :  { %v2675_v51 = vld [vmem:[#allocation6 + $0x214] sm:$0xf0]  ;;  %v2583_v59 = vor.u32 %v2799_v47, %v2582_v46  ;;  %v2438_v60 = vld [vmem:[#allocation6 + $0x4c8] sm:$0xf]  ;;  %v2328_v28 = vld [vmem:[#allocation6 + $0x3f8] sm:$0xf0] }
  0x88   :  { %1547 = vmatpush.bf16.msra.mxu2 %v2311_v40  ;;  %v1958_v40 = vld [vmem:[#allocation6 + $0x108] sm:$0xf]  ;;  %v2707_v55 = vld [vmem:[#allocation6 + $0x314] sm:$0xf0] }
  0x89   :  { %1535 = vmatpush.bf16.msra.mxu0 %v2167_v53  ;;  %v1831_v53 = vor.u32 %v2611_v39, %v1830_v38  ;;  %v2598_v61 = vld [vmem:[#allocation6 + $0x608] sm:$0xf]  ;;  %v2803_v62 = vld [vmem:[#allocation6 + $0x614] sm:$0xf0]  ;;  %v2215_v3 = vor.u32 %v2707_v55, %v2214_v52  ;;  %v2625_v39 = vld [vmem:[#allocation6 + $0x8c] sm:$0xf] }
  0x8a   :  { %1510 = vmatpush.bf16.msrb.mxu1 %v1895_v57  ;;  %1523 = vmatpush.bf16.msrb.mxu3 %v2023_v58  ;;  %v1944_v57 = vld [vmem:[#allocation6 + $0xf8] sm:$0xf0]  ;;  %v2455_v58 = vor.u32 %v2767_v45, %v2454_v44  ;;  %v2763_v63 = vld [vmem:[#allocation6 + $0x4d4] sm:$0xf0]  ;;  %v2566_v0 = vld [vmem:[#allocation6 + $0x5c8] sm:$0xf] }
  0x8b   :  { %v1947_v5 = vor.u32 %v2637_v56, %v1944_v57  ;;  %v2439_v11 = vor.u32 %v2763_v63, %v2438_v60  ;;  %v2422_v16 = vld [vmem:[#allocation6 + $0x4a8] sm:$0xf]  ;;  %v2791_v20 = vld [vmem:[#allocation6 + $0x5b4] sm:$0xf0] }
  0x8c   :  { %1548 = vmatpush.bf16.msra.mxu2 %v2295_v54  ;;  %2605 = vmatmul.msk.bf16.vlgmr.msrb.gmra.mxu0 %vm1321_vm0, %v3014_v19  ;;  %v1959_v54 = vor.u32 %v2643_v43, %v1958_v40  ;;  %v2406_v29 = vld [vmem:[#allocation6 + $0x488] sm:$0xf]  ;;  %v2787_v32 = vld [vmem:[#allocation6 + $0x594] sm:$0xf0]  ;;  %v1896_v40 = vld [vmem:[#allocation6 + $0x98] sm:$0xf0] }
  0x8d   :  { %1536 = vmatpush.bf16.msra.mxu0 %v2151_v1  ;;  %v2795_v1 = vld [vmem:[#allocation6 + $0x5d4] sm:$0xf0]  ;;  %v2390_v43 = vld [vmem:[#allocation6 + $0x468] sm:$0xf] }
  0x8e   :  { %1511 = vmatpush.bf16.msrb.mxu1 %v1879_v7  ;;  %1524 = vmatpush.bf16.msrb.mxu3 %v2007_v8  ;;  %v2599_v7 = vor.u32 %v2803_v62, %v2598_v61  ;;  %v2669_v8 = vld [vmem:[#allocation6 + $0x1ec] sm:$0xf]  ;;  %v2567_v13 = vor.u32 %v2795_v1, %v2566_v0  ;;  %v2751_v44 = vld [vmem:[#allocation6 + $0x474] sm:$0xf0]  ;;  %v2518_v45 = vld [vmem:[#allocation6 + $0x568] sm:$0xf] }
  0x8f   :  { %v2075_v21 = vor.u32 %v2669_v8, %v2072_v10  ;;  %v2783_v46 = vld [vmem:[#allocation6 + $0x574] sm:$0xf0]  ;;  %v2374_v55 = vld [vmem:[#allocation6 + $0x448] sm:$0xf]  ;;  %v2653_v61 = vld [vmem:[#allocation6 + $0x16c] sm:$0xf] }
  0x90   :  { %1549 = vmatpush.bf16.msra.mxu2 %v2279_v2  ;;  %v2087_v2 = vor.u32 %v2675_v51, %v2086_v50  ;;  %v2024_v50 = vld [vmem:[#allocation6 + $0x198] sm:$0xf0]  ;;  %v2391_v51 = vor.u32 %v2751_v44, %v2390_v43  ;;  %v2519_v52 = vor.u32 %v2783_v46, %v2518_v45  ;;  %v2747_v56 = vld [vmem:[#allocation6 + $0x454] sm:$0xf0]  ;;  %v2502_v57 = vld [vmem:[#allocation6 + $0x548] sm:$0xf] }
  0x91   :  { %1537 = vmatpush.bf16.msra.mxu0 %v2135_v17  ;;  %v2759_v17 = vld [vmem:[#allocation6 + $0x4b4] sm:$0xf0]  ;;  %v2008_v62 = vld [vmem:[#allocation6 + $0x178] sm:$0xf0]  ;;  %v2375_v63 = vor.u32 %v2747_v56, %v2374_v55  ;;  %v2617_v1 = vld [vmem:[#allocation6 + $0x4c] sm:$0xf] }
  0x92   :  { %1512 = vmatpush.bf16.msrb.mxu1 %v1863_v22  ;;  %1525 = vmatpush.bf16.msrb.mxu3 %v1991_v23  ;;  %v1931_v22 = vor.u32 %v2633_v14, %v1928_v15  ;;  %v2665_v23 = vld [vmem:[#allocation6 + $0x1cc] sm:$0xf]  ;;  %v2423_v25 = vor.u32 %v2759_v17, %v2422_v16  ;;  %v2775_v8 = vld [vmem:[#allocation6 + $0x534] sm:$0xf0]  ;;  %v2011_v10 = vor.u32 %v2653_v61, %v2008_v62  ;;  %v1992_v14 = vld [vmem:[#allocation6 + $0x158] sm:$0xf0] }
  0x93   :  { %v2059_v33 = vor.u32 %v2665_v23, %v2056_v24  ;;  %v2613_v15 = vld [vmem:[#allocation6 + $0x2c] sm:$0xf]  ;;  %v2771_v23 = vld [vmem:[#allocation6 + $0x514] sm:$0xf0]  ;;  %v2184_v44 = vld [vmem:[#allocation6 + $0x2d8] sm:$0xf0] }
  0x94   :  { %1550 = vmatpush.bf16.msra.mxu2 %v2263_v18  ;;  %v2550_v18 = vld [vmem:[#allocation6 + $0x5a8] sm:$0xf]  ;;  %v2701_v24 = vld [vmem:[#allocation6 + $0x2ec] sm:$0xf]  ;;  %v2312_v46 = vld [vmem:[#allocation6 + $0x3d8] sm:$0xf0] }
  0x95   :  { %1538 = vmatpush.bf16.msra.mxu0 %v2119_v30  ;;  %v2551_v26 = vor.u32 %v2791_v20, %v2550_v18  ;;  %v2755_v30 = vld [vmem:[#allocation6 + $0x494] sm:$0xf0]  ;;  %v1848_v18 = vld [vmem:[#allocation6 + $0x38] sm:$0xf0]  ;;  %v2342_v20 = vld [vmem:[#allocation6 + $0x408] sm:$0xf] }
  0x96   :  { %1513 = vmatpush.bf16.msrb.mxu1 %v1847_v35  ;;  %1526 = vmatpush.bf16.msrb.mxu3 %v1975_v36  ;;  %v2661_v35 = vld [vmem:[#allocation6 + $0x1ac] sm:$0xf]  ;;  %v2040_v36 = vld [vmem:[#allocation6 + $0x1b8] sm:$0xf0]  ;;  %v2407_v37 = vor.u32 %v2755_v30, %v2406_v29  ;;  %v1851_v29 = vor.u32 %v2613_v15, %v1848_v18 }
  0x97   :  { %v2043_v47 = vor.u32 %v2661_v35, %v2040_v36  ;;  %v2645_v30 = vld [vmem:[#allocation6 + $0x12c] sm:$0xf]  ;;  %v2331_v36 = vor.u32 %v2733_v27, %v2328_v28  ;;  %v2296_v62 = vld [vmem:[#allocation6 + $0x3b8] sm:$0xf0] }
  0x98   :  { %1551 = vmatpush.bf16.msra.mxu2 %v2247_v31  ;;  %v2534_v31 = vld [vmem:[#allocation6 + $0x588] sm:$0xf]  ;;  %v2697_v43 = vld [vmem:[#allocation6 + $0x2cc] sm:$0xf]  ;;  %v2264_v27 = vld [vmem:[#allocation6 + $0x378] sm:$0xf0] }
  0x99   :  { %1539 = vmatpush.bf16.msra.mxu0 %v2103_v48  ;;  %v2535_v38 = vor.u32 %v2787_v32, %v2534_v31  ;;  %v1899_v48 = vor.u32 %v2625_v39, %v1896_v40  ;;  %v1976_v31 = vld [vmem:[#allocation6 + $0x138] sm:$0xf0]  ;;  %v2729_v45 = vld [vmem:[#allocation6 + $0x3cc] sm:$0xf] }
  0x9a   :  { %1514 = vmatpush.bf16.msrb.mxu1 %v1831_v53  ;;  %1527 = vmatpush.bf16.msrb.mxu3 %v1959_v54  ;;  %v2621_v53 = vld [vmem:[#allocation6 + $0x6c] sm:$0xf]  ;;  %v1880_v54 = vld [vmem:[#allocation6 + $0x78] sm:$0xf0]  ;;  %v1979_v40 = vor.u32 %v2645_v30, %v1976_v31  ;;  %v2315_v55 = vor.u32 %v2729_v45, %v2312_v46 }
  0x9b   :  { %v1883_v60 = vor.u32 %v2621_v53, %v1880_v54  ;;  %v2456_v39 = vld [vmem:[#allocation6 + $0x4f8] sm:$0xf0]  ;;  %v2187_v53 = vor.u32 %v2697_v43, %v2184_v44  ;;  %v2761_v54 = vld [vmem:[#allocation6 + $0x4cc] sm:$0xf]  ;;  %v3044_v44 = vld [vmem:[#allocation8] sm:$0xf] }
  0x9c   :  { %1552 = vmatpush.bf16.msra.mxu2 %v2231_v49  ;;  %v2657_v49 = vld [vmem:[#allocation6 + $0x18c] sm:$0xf]  ;;  %v2520_v43 = vld [vmem:[#allocation6 + $0x578] sm:$0xf0] }
  0x9d   :  { %1540 = vmatpush.bf16.msra.mxu0 %v2087_v2  ;;  %1528 = vmatmul.bf16.vlgmr.msrb.gmra.mxu3 %v3008_v12  ;;  %v1864_v2 = vld [vmem:[#allocation6 + $0x58] sm:$0xf0]  ;;  %v2725_v61 = vld [vmem:[#allocation6 + $0x3ac] sm:$0xf] }
  0x9e   :  { %1559 = vmatpush.bf16.msra.mxu1 %v2455_v58  ;;  %1572 = vmatpush.bf16.msra.mxu3 %v2583_v59  ;;  %v2779_v58 = vld [vmem:[#allocation6 + $0x554] sm:$0xf0]  ;;  %v2027_v59 = vor.u32 %v2657_v49, %v2024_v50  ;;  %v2797_v50 = vld [vmem:[#allocation6 + $0x5ec] sm:$0xf] }
  0x9f   :  { %1515 = vmatmul.bf16.vlgmr.msrb.gmra.mxu1 %v3004_v6  ;;  %v2503_v0 = vor.u32 %v2779_v58, %v2502_v57  ;;  %v2440_v57 = vld [vmem:[#allocation6 + $0x4d8] sm:$0xf0]  ;;  %v2693_v58 = vld [vmem:[#allocation6 + $0x2ac] sm:$0xf] }
  0xa0   :  { %1553 = vmatpush.bf16.msra.mxu2 %v2215_v3  ;;  %1541 = vmatmul.bf16.vlgmr.msra.gmra.mxu0 %v3002_v4  ;;  %v2358_v3 = vld [vmem:[#allocation6 + $0x428] sm:$0xf]  ;;  %v2789_v15 = vld [vmem:[#allocation6 + $0x5ac] sm:$0xf] }
  0xa1   :  { %1592 = vmatpush.bf16.msrb.mxu0 %v2599_v7  ;;  %v2486_v7 = vld [vmem:[#allocation6 + $0x528] sm:$0xf]  ;;  %v2785_v28 = vld [vmem:[#allocation6 + $0x58c] sm:$0xf] }
  0xa2   :  { %1560 = vmatpush.bf16.msra.mxu1 %v2439_v11  ;;  %1573 = vmatpush.bf16.msra.mxu3 %v2567_v13  ;;  %v1867_v11 = vor.u32 %v2617_v1, %v1864_v2  ;;  %v2649_v13 = vld [vmem:[#allocation6 + $0x14c] sm:$0xf]  ;;  %v2487_v17 = vor.u32 %v2775_v8, %v2486_v7  ;;  %v2443_v1 = vor.u32 %v2761_v54, %v2440_v57  ;;  %v2424_v7 = vld [vmem:[#allocation6 + $0x4b8] sm:$0xf0] }
  0xa3   :  { %1554 = vmatmul.bf16.vlgmr.msra.gmra.mxu2 %v3006_v9  ;;  %v2689_v8 = vld [vmem:[#allocation6 + $0x28c] sm:$0xf]  ;;  %v2504_v57 = vld [vmem:[#allocation6 + $0x558] sm:$0xf0] }
  0xa4   :  { %1598 = vmatpush.bf16.msrb.mxu2 %v1947_v5  ;;  %v2743_v5 = vld [vmem:[#allocation6 + $0x434] sm:$0xf0]  ;;  %v2749_v31 = vld [vmem:[#allocation6 + $0x46c] sm:$0xf] }
  0xa5   :  { %1611 = vmatpush.bf16.msra.mxu0 %v2075_v21  ;;  %v2359_v16 = vor.u32 %v2743_v5, %v2358_v3  ;;  %v2739_v21 = vld [vmem:[#allocation6 + $0x414] sm:$0xf0]  ;;  %v2757_v3 = vld [vmem:[#allocation6 + $0x4ac] sm:$0xf]  ;;  %v2299_v5 = vor.u32 %v2725_v61, %v2296_v62 }
  0xa6   :  { %1561 = vmatpush.bf16.msra.mxu1 %v2423_v25  ;;  %1574 = vmatpush.bf16.msra.mxu3 %v2551_v26  ;;  %v1995_v25 = vor.u32 %v2649_v13, %v1992_v14  ;;  %v2200_v26 = vld [vmem:[#allocation6 + $0x2f8] sm:$0xf0]  ;;  %v2343_v32 = vor.u32 %v2739_v21, %v2342_v20  ;;  %v2721_v13 = vld [vmem:[#allocation6 + $0x38c] sm:$0xf] }
  0xa7   :  { %v2203_v35 = vor.u32 %v2701_v24, %v2200_v26  ;;  %v2280_v14 = vld [vmem:[#allocation6 + $0x398] sm:$0xf0]  ;;  %v2753_v20 = vld [vmem:[#allocation6 + $0x48c] sm:$0xf] }
  0xa8   :  { %1599 = vmatpush.bf16.msrb.mxu2 %v1931_v22  ;;  %v2470_v22 = vld [vmem:[#allocation6 + $0x508] sm:$0xf]  ;;  %v2283_v21 = vor.u32 %v2721_v13, %v2280_v14  ;;  %v2136_v24 = vld [vmem:[#allocation6 + $0x278] sm:$0xf0]  ;;  %v2717_v26 = vld [vmem:[#allocation6 + $0x36c] sm:$0xf] }
  0xa9   :  { %1612 = vmatpush.bf16.msra.mxu0 %v2059_v33  ;;  %v2471_v33 = vor.u32 %v2771_v23, %v2470_v22  ;;  %v2408_v22 = vld [vmem:[#allocation6 + $0x498] sm:$0xf0]  ;;  %v2685_v23 = vld [vmem:[#allocation6 + $0x26c] sm:$0xf] }
  0xaa   :  { %1562 = vmatpush.bf16.msra.mxu1 %v2407_v37  ;;  %1575 = vmatpush.bf16.msra.mxu3 %v2535_v38  ;;  %v1832_v37 = vld [vmem:[#allocation6 + $0x18] sm:$0xf0]  ;;  %v2765_v38 = vld [vmem:[#allocation6 + $0x4ec] sm:$0xf]  ;;  %v2139_v30 = vor.u32 %v2685_v23, %v2136_v24 }
  0xab   :  { %v2709_v54 = vld [vmem:[#allocation6 + $0x32c] sm:$0xf]  ;;  %v2600_v13 = vld [vmem:[#allocation6 + $0x618] sm:$0xf0] }
  0xac   :  { %1600 = vmatpush.bf16.msrb.mxu2 %v1915_v34  ;;  %v2609_v34 = vld [vmem:[#allocation6 + $0xc] sm:$0xf] }
  0xad   :  { %1613 = vmatpush.bf16.msra.mxu0 %v2043_v47  ;;  %v2641_v47 = vld [vmem:[#allocation6 + $0x10c] sm:$0xf]  ;;  %v1835_v49 = vor.u32 %v2609_v34, %v1832_v37  ;;  %v2392_v34 = vld [vmem:[#allocation6 + $0x478] sm:$0xf0] }
  0xae   :  { %1563 = vmatpush.bf16.msra.mxu1 %v2391_v51  ;;  %1576 = vmatpush.bf16.msra.mxu3 %v2519_v52  ;;  %v2584_v51 = vld [vmem:[#allocation6 + $0x5f8] sm:$0xf0]  ;;  %v2459_v52 = vor.u32 %v2765_v38, %v2456_v39  ;;  %v2713_v38 = vld [vmem:[#allocation6 + $0x34c] sm:$0xf]  ;;  %v2395_v45 = vor.u32 %v2749_v31, %v2392_v34 }
  0xaf   :  { %v2248_v39 = vld [vmem:[#allocation6 + $0x358] sm:$0xf0]  ;;  %v2741_v62 = vld [vmem:[#allocation6 + $0x42c] sm:$0xf] }
  0xb0   :  { %1601 = vmatpush.bf16.msrb.mxu2 %v1899_v48  ;;  %2606 = vmatmul.msk.bf16.vlgmr.msrb.gmra.mxu0 %vm1321_vm0, %v3014_v19  ;;  %v1960_v48 = vld [vmem:[#allocation6 + $0x118] sm:$0xf0]  ;;  %v2773_v14 = vld [vmem:[#allocation6 + $0x52c] sm:$0xf] }
  0xb1   :  { %1614 = vmatpush.bf16.msra.mxu0 %v2027_v59  ;;  %v1963_v56 = vor.u32 %v2641_v47, %v1960_v48  ;;  %v2168_v59 = vld [vmem:[#allocation6 + $0x2b8] sm:$0xf0]  ;;  %v2745_v47 = vld [vmem:[#allocation6 + $0x44c] sm:$0xf] }
  0xb2   :  { %1564 = vmatpush.bf16.msra.mxu1 %v2375_v63  ;;  %1577 = vmatpush.bf16.msra.mxu3 %v2503_v0  ;;  %v2793_v63 = vld [vmem:[#allocation6 + $0x5cc] sm:$0xf]  ;;  %v2568_v0 = vld [vmem:[#allocation6 + $0x5d8] sm:$0xf0]  ;;  %v2171_v2 = vor.u32 %v2693_v58, %v2168_v59  ;;  %v333_v58 = vperm.slane %v3044_v44, 0 }
  0xb4   :  { %1602 = vmatpush.bf16.msrb.mxu2 %v1883_v60  ;;  %v2587_v60 = vor.u32 %v2797_v50, %v2584_v51  ;;  %v2376_v50 = vld [vmem:[#allocation6 + $0x458] sm:$0xf0]  ;;  %v2677_v51 = vld [vmem:[#allocation6 + $0x22c] sm:$0xf] }
  0xb5   :  { %1615 = vmatpush.bf16.msra.mxu0 %v2011_v10  ;;  %v2152_v10 = vld [vmem:[#allocation6 + $0x298] sm:$0xf0] }
  0xb6   :  { %1565 = vmatpush.bf16.msra.mxu1 %v2359_v16  ;;  %1578 = vmatpush.bf16.msra.mxu3 %v2487_v17  ;;  %v2552_v16 = vld [vmem:[#allocation6 + $0x5b8] sm:$0xf0]  ;;  %v2427_v17 = vor.u32 %v2757_v3, %v2424_v7  ;;  %v2155_v18 = vor.u32 %v2689_v8, %v2152_v10  ;;  %v2705_v3 = vld [vmem:[#allocation6 + $0x30c] sm:$0xf] }
  0xb7   :  { %v2216_v8 = vld [vmem:[#allocation6 + $0x318] sm:$0xf0] }
  0xb8   :  { %1603 = vmatpush.bf16.msrb.mxu2 %v1867_v11  ;;  %v2571_v11 = vor.u32 %v2793_v63, %v2568_v0  ;;  %v2360_v63 = vld [vmem:[#allocation6 + $0x438] sm:$0xf0] }
  0xb9   :  { %1616 = vmatpush.bf16.msra.mxu0 %v1995_v25  ;;  %v2555_v25 = vor.u32 %v2789_v15, %v2552_v16  ;;  %v2488_v15 = vld [vmem:[#allocation6 + $0x538] sm:$0xf0]  ;;  %v2363_v16 = vor.u32 %v2741_v62, %v2360_v63 }
  0xba   :  { %1566 = vmatpush.bf16.msra.mxu1 %v2343_v32  ;;  %1579 = vmatpush.bf16.msra.mxu3 %v2471_v33  ;;  %v2267_v32 = vor.u32 %v2717_v26, %v2264_v27  ;;  %v2769_v26 = vld [vmem:[#allocation6 + $0x50c] sm:$0xf]  ;;  %v2472_v27 = vld [vmem:[#allocation6 + $0x518] sm:$0xf0] }
  0xbc   :  { %1604 = vmatpush.bf16.msrb.mxu2 %v1851_v29  ;;  %v2411_v29 = vor.u32 %v2753_v20, %v2408_v22  ;;  %v2219_v20 = vor.u32 %v2705_v3, %v2216_v8  ;;  %v2344_v22 = vld [vmem:[#allocation6 + $0x418] sm:$0xf0] }
  0xbd   :  { %1617 = vmatpush.bf16.msra.mxu0 %v1979_v40  ;;  %1567 = vmatmul.bf16.vlgmr.msra.gmra.mxu1 %v3018_v41  ;;  %v2781_v40 = vld [vmem:[#allocation6 + $0x56c] sm:$0xf] }
  0xbe   :  { %1624 = vmatpush.bf16.msrb.mxu1 %v2203_v35  ;;  %1637 = vmatpush.bf16.msrb.mxu3 %v2331_v36  ;;  %v2681_v35 = vld [vmem:[#allocation6 + $0x24c] sm:$0xf]  ;;  %v2120_v36 = vld [vmem:[#allocation6 + $0x258] sm:$0xf0] }
  0xbf   :  { %1580 = vmatmul.bf16.vlgmr.msra.gmra.mxu3 %v3020_v42  ;;  %v2123_v46 = vor.u32 %v2681_v35, %v2120_v36 }
  0xc0   :  { %1605 = vmatpush.bf16.msrb.mxu2 %v1835_v49  ;;  %v1334_v33 = vpop.f32.mrf.mxu0  ;;  %v2251_v49 = vor.u32 %v2713_v38, %v2248_v39 }
  0xc1   :  { %1618 = vmatpush.bf16.msra.mxu0 %v1963_v56  ;;  %v2777_v56 = vld [vmem:[#allocation6 + $0x54c] sm:$0xf]  ;;  %v1335_v24 = vadd.f32 %v1334_v33, %v333_v58 }
  0xc2   :  { %1625 = vmatpush.bf16.msrb.mxu1 %v2187_v53  ;;  %1638 = vmatpush.bf16.msrb.mxu3 %v2315_v55  ;;  %v2523_v53 = vor.u32 %v2781_v40, %v2520_v43  ;;  %v2232_v55 = vld [vmem:[#allocation6 + $0x338] sm:$0xf0]  ;;  %v2507_v7 = vor.u32 %v2777_v56, %v2504_v57 }
  0xc3   :  { %1606 = vmatmul.bf16.vlgmr.msrb.gmra.mxu2 %v3004_v6  ;;  %v2536_v6 = vld [vmem:[#allocation6 + $0x598] sm:$0xf0]  ;;  %v2235_v0 = vor.u32 %v2709_v54, %v2232_v55 }
  0xc4   :  { %1650 = vmatpush.bf16.msra.mxu2 %v2459_v52  ;;  %1619 = vmatmul.bf16.vlgmr.msra.gmra.mxu0 %v3008_v12  ;;  %v2539_v37 = vor.u32 %v2785_v28, %v2536_v6  ;;  %v3042_v12 = vpop.f32.mrf.mxu1  ;;  %v2104_v52 = vld [vmem:[#allocation6 + $0x238] sm:$0xf0] }
  0xc5   :  { %1663 = vmatpush.bf16.msrb.mxu0 %v2587_v60  ;;  %v2379_v60 = vor.u32 %v2745_v47, %v2376_v50  ;;  %v2107_v61 = vor.u32 %v2677_v51, %v2104_v52 }
  0xc6   :  { %1626 = vmatpush.bf16.msrb.mxu1 %v2171_v2  ;;  %1639 = vmatpush.bf16.msrb.mxu3 %v2299_v5  ;;  %v1360_v48 = vpop.f32.mrf.mxu2  ;;  %v2088_v2 = vld [vmem:[#allocation6 + $0x218] sm:$0xf0] }
  0xc7   :  { %v1373_v59 = vpop.f32.mrf.mxu3 }
  0xc8   :  { %1651 = vmatpush.bf16.msra.mxu2 %v2443_v1  ;;  %v2673_v1 = vld [vmem:[#allocation6 + $0x20c] sm:$0xf]  ;;  %v1336_v5 = vpop.f32.mrf.mxu0 }
  0xc9   :  { %1664 = vmatpush.bf16.msrb.mxu0 %v2571_v11  ;;  %v2801_v11 = vld [vmem:[#allocation6 + $0x60c] sm:$0xf] }
  0xca   :  { %1627 = vmatpush.bf16.msrb.mxu1 %v2155_v18  ;;  %1640 = vmatpush.bf16.msrb.mxu3 %v2283_v21  ;;  %v2737_v21 = vld [vmem:[#allocation6 + $0x40c] sm:$0xf]  ;;  %v2603_v23 = vor.u32 %v2801_v11, %v2600_v13 }
  0xcb   :  { %v2347_v28 = vor.u32 %v2737_v21, %v2344_v22  ;;  %v1701_v21 = vld [vmem:[#allocation9] sm:$0xff] }
  0xcc   :  { %1652 = vmatpush.bf16.msra.mxu2 %v2427_v17  ;;  %v1349_v10 = vpop.f32.mrf.mxu1  ;;  %v2091_v17 = vor.u32 %v2673_v1, %v2088_v2 }
  0xcd   :  { %1665 = vmatpush.bf16.msrb.mxu0 %v2555_v25  ;;  %v2491_v25 = vor.u32 %v2773_v14, %v2488_v15  ;;  %v335_v10 = vperm.slane %v3044_v44, 2 }
  0xce   :  { %1628 = vmatpush.bf16.msrb.mxu1 %v2139_v30  ;;  %1641 = vmatpush.bf16.msrb.mxu3 %v2267_v32  ;;  %v1362_v18 = vpop.f32.mrf.mxu2  ;;  %v2475_v30 = vor.u32 %v2769_v26, %v2472_v27 }
  0xcf   :  { %v1375_v6 = vpop.f32.mrf.mxu3 }
  0xd0   :  { %1653 = vmatpush.bf16.msra.mxu2 %v2411_v29  ;;  %v1348_v29 = vadd.f32 %v3042_v12, %v1335_v24 }
  0xd1   :  { %1666 = vmatpush.bf16.msrb.mxu0 %v2539_v37 }
  0xd2   :  { %1629 = vmatpush.bf16.msrb.mxu1 %v2123_v46  ;;  %1642 = vmatpush.bf16.msrb.mxu3 %v2251_v49  ;;  %v1361_v31 = vadd.f32 %v1360_v48, %v1348_v29  ;;  %v1702_v29 = vld [vmem:[#allocation9 + $0x8] sm:$0xff] }
  0xd4   :  { %1654 = vmatpush.bf16.msra.mxu2 %v2395_v45  ;;  %v1374_v32 = vadd.f32 %v1373_v59, %v1361_v31  ;;  %v334_v45 = vperm.slane %v3044_v44, 1 }
  0xd5   :  { %1667 = vmatpush.bf16.msrb.mxu0 %v2523_v53 }
  0xd6   :  { %1630 = vmatpush.bf16.msrb.mxu1 %v2107_v61  ;;  %1643 = vmatpush.bf16.msrb.mxu3 %v2235_v0  ;;  %v1412_v36 = vpop.f32.mrf.mxu2 }
  0xd8   :  { %1655 = vmatpush.bf16.msra.mxu2 %v2379_v60 }
  0xd9   :  { %1668 = vmatpush.bf16.msrb.mxu0 %v2507_v7  ;;  %v1386_v33 = vpop.f32.mrf.mxu0 }
  0xda   :  { %1631 = vmatpush.bf16.msrb.mxu1 %v2091_v17  ;;  %1644 = vmatpush.bf16.msrb.mxu3 %v2219_v20  ;;  %v1399_v34 = vpop.f32.mrf.mxu1  ;;  %v1387_v35 = vadd.f32 %v1386_v33, %v1374_v32 }
  0xdc   :  { %1656 = vmatpush.bf16.msra.mxu2 %v2363_v16  ;;  %v1400_v37 = vadd.f32 %v1399_v34, %v1387_v35  ;;  %v1703_v35 = vld [vmem:[#allocation9 + $0x10] sm:$0xff] }
  0xdd   :  { %1669 = vmatpush.bf16.msrb.mxu0 %v2491_v25  ;;  %1632 = vmatmul.bf16.vlgmr.msrb.gmra.mxu1 %v3002_v4 }
  0xde   :  { %1683 = vmatpush.bf16.msra.mxu1 %v2603_v23  ;;  %1645 = vmatmul.bf16.vlgmr.msrb.gmra.mxu3 %v3006_v9  ;;  %v1413_v12 = vadd.f32 %v1412_v36, %v1400_v37  ;;  %v1414_v40 = vpop.f32.mrf.mxu2  ;;  %v1785_v36 = vld [vmem:[#allocation2] sm:$0x1]  ;;  %v336_v37 = vperm.slane %v3044_v44, 3 }
  0xe0   :  { %1657 = vmatpush.bf16.msra.mxu2 %v2347_v28  ;;  %vm1689_vm1 = vcmp.gt.f32.partialorder %v1413_v12, 0.0  ;;  %v1693_v38 = vmul.f32 0.1, %v1413_v12 }
  0xe1   :  { %1670 = vmatpush.bf16.msrb.mxu0 %v2475_v30  ;;  %v1388_v4 = vpop.f32.mrf.mxu0 }
  0xe2   :  { %v1425_v39 = vpop.f32.mrf.mxu3  ;;  %v1401_v9 = vpop.f32.mrf.mxu1  ;;  %v1697_v43 = vsel %vm1689_vm1, %v1413_v12, %v1693_v38  ;;  %v2955_v12 = vmov 0  }
  0xe3   :  { %1658 = vmatmul.bf16.vlgmr.msra.gmra.mxu2 %v3018_v41  ;;  %1720 = vmatpush.xpose.msra.mxu3 %v1697_v43  ;;  %v1426_v46 = vadd.f32 %v1425_v39, %v334_v45 }
  0xe4   :  { %1671 = vmatmul.bf16.vlgmr.msrb.gmra.mxu0 %v3020_v42  ;;  %2814 = vset.pattern.permute.xlu0 %v2955_v12 }
  0xe5   :  { %1788 = vperm.xlu0 %2814, %v1785_v36  }
  0xe6   :  { %v1438_v42 = vpop.f32.mrf.mxu2 }
  0xe7   :  { %v1439_v48 = vadd.f32 %v1438_v42, %v1426_v46 }
  0xea   :  { %v1427_v41 = vpop.f32.mrf.mxu3 }
  0xed   :  { %2607 = vmatmul.msk.bf16.vlgmr.msra.gmra.mxu1 %vm1321_vm0, %v3014_v19 }
  0xee   :  { %v1440_v47 = vpop.f32.mrf.mxu2  ;;  %1721 = vmatmul.f32.vlgmr.msra.gmra.mxu3 %v1701_v21 }
  0xf9   :  { %v1451_v49 = vpop.f32.mrf.mxu0 }
  0xfa   :  { %v1452_v50 = vadd.f32 %v1451_v49, %v1439_v48 }
  0xfc   :  { %v1464_v51 = vpop.f32.mrf.mxu1 }
  0xfd   :  { %v1465_v52 = vadd.f32 %v1464_v51, %v1452_v50 }
 0x100   :  { %v1477_v54 = vpop.f32.mrf.mxu3 }
 0x101   :  { %v1453_v53 = vpop.f32.mrf.mxu0  ;;  %v1478_v19 = vadd.f32 %v1477_v54, %v1465_v52  ;;  %v1704_v54 = vld [vmem:[#allocation9 + $0x18] sm:$0xff] }
 0x104   :  { %v1466_v57 = vpop.f32.mrf.mxu1 }
 0x106   :  { %v1490_v55 = vpop.f32.mrf.mxu2 }
 0x107   :  { %v1491_v56 = vadd.f32 %v1490_v55, %v1478_v19 }
 0x108   :  { %v1479_v60 = vpop.f32.mrf.mxu3 }
 0x109   :  { %v1503_v58 = vpop.f32.mrf.mxu0 }
 0x10a   :  { %v1504_v59 = vadd.f32 %v1503_v58, %v1491_v56 }
 0x10c   :  { %vm1690_vm2 = vcmp.gt.f32.partialorder %v1504_v59, 0.0  ;;  %v1694_v62 = vmul.f32 0.1, %v1504_v59 }
 0x10e   :  { %v1492_v61 = vpop.f32.mrf.mxu2  ;;  %v1698_v63 = vsel %vm1690_vm2, %v1504_v59, %v1694_v62 }
 0x10f   :  { %1740 = vmatpush.xpose.msrb.mxu3 %v1698_v63 }
 0x111   :  { %v1505_v0 = vpop.f32.mrf.mxu0 }
 0x112   :  { %1741 = vmatmul.f32.vlgmr.msrb.gmra.mxu3 %v1702_v29 }
 0x11c   :  { %v1516_v2 = vpop.f32.mrf.mxu1 }
 0x11d   :  { %v1542_v1 = vpop.f32.mrf.mxu0  ;;  %v1517_v14 = vadd.f32 %v1516_v2, %v335_v10 }
 0x120   :  { %v1529_v3 = vpop.f32.mrf.mxu3 }
 0x121   :  { %v1530_v16 = vadd.f32 %v1529_v3, %v1517_v14 }
 0x123   :  { %v1543_v18 = vadd.f32 %v1542_v1, %v1530_v16 }
 0x124   :  { %v1518_v7 = vpop.f32.mrf.mxu1 }
 0x125   :  { %v1544_v5 = vpop.f32.mrf.mxu0 }
 0x126   :  { %v1555_v8 = vpop.f32.mrf.mxu2 }
 0x127   :  { %v1556_v22 = vadd.f32 %v1555_v8, %v1543_v18 }
 0x128   :  { %v1531_v11 = vpop.f32.mrf.mxu3 }
 0x12d   :  { %v1594_v13 = vpop.f32.mrf.mxu0 }
 0x12e   :  { %v1557_v15 = vpop.f32.mrf.mxu2 }
 0x135   :  { %v1596_v17 = vpop.f32.mrf.mxu0 }
 0x13a   :  { %v1568_v20 = vpop.f32.mrf.mxu1 }
 0x13b   :  { %v1569_v23 = vadd.f32 %v1568_v20, %v1556_v22 }
 0x141   :  { %v1620_v26 = vpop.f32.mrf.mxu0 }
 0x142   :  { %v1581_v24 = vpop.f32.mrf.mxu3  ;;  %v1570_v27 = vpop.f32.mrf.mxu1 }
 0x143   :  { %v1582_v25 = vadd.f32 %v1581_v24, %v1569_v23 }
 0x145   :  { %v1595_v28 = vadd.f32 %v1594_v13, %v1582_v25 }
 0x146   :  { %v1607_v6 = vpop.f32.mrf.mxu2 }
 0x147   :  { %v1695_v30 = vmul.f32 0.1, %v1595_v28  ;;  %vm1691_vm3 = vcmp.gt.f32.partialorder %v1595_v28, 0.0  ;;  %v1608_v38 = vadd.f32 %v1607_v6, %v336_v37 }
 0x149   :  { %v1699_v31 = vsel %vm1691_vm3, %v1595_v28, %v1695_v30  ;;  %v1622_v33 = vpop.f32.mrf.mxu0  ;;  %v1621_v4 = vadd.f32 %v1620_v26, %v1608_v38 }
 0x14a   :  { %1760 = vmatpush.xpose.msrb.mxu1 %v1699_v31  ;;  %v1583_v32 = vpop.f32.mrf.mxu3 }
 0x14d   :  { %1761 = vmatmul.f32.vlgmr.msrb.gmra.mxu1 %v1703_v35 }
 0x14e   :  { %v1609_v34 = vpop.f32.mrf.mxu2 }
 0x157   :  { %v1789_v59 = vpop.permute.xlu0 %1788 }
 0x158   :  { %v1791_v61 = vperm.slane %v1789_v59, 0 }
 0x15a   :  { %v1633_v39 = vpop.f32.mrf.mxu1 }
 0x15b   :  { %v1634_v9 = vadd.f32 %v1633_v39, %v1621_v4 }
 0x161   :  { %v1672_v40 = vpop.f32.mrf.mxu0  ;;  %v1646_v43 = vpop.f32.mrf.mxu3 }
 0x162   :  { %v1647_v41 = vadd.f32 %v1646_v43, %v1634_v9  ;;  %v1635_v42 = vpop.f32.mrf.mxu1 }
 0x166   :  { %v1659_v45 = vpop.f32.mrf.mxu2 }
 0x167   :  { %v1660_v46 = vadd.f32 %v1659_v45, %v1647_v41 }
 0x169   :  { %v1674_v47 = vpop.f32.mrf.mxu0  ;;  %v1648_v48 = vpop.f32.mrf.mxu3  ;;  %v1673_v49 = vadd.f32 %v1672_v40, %v1660_v46 }
 0x16a   :  { %v1685_v50 = vpop.f32.mrf.mxu1 }
 0x16b   :  { %v1686_v51 = vadd.f32 %v1685_v50, %v1673_v49 }
 0x16d   :  { %vm1692_vm4 = vcmp.gt.f32.partialorder %v1686_v51, 0.0  ;;  %v1696_v44 = vmul.f32 0.1, %v1686_v51 }
 0x16e   :  { %v1661_v52 = vpop.f32.mrf.mxu2 }
 0x16f   :  { %v1700_v53 = vsel %vm1692_vm4, %v1686_v51, %v1696_v44 }
 0x170   :  { %1780 = vmatpush.xpose.msrb.mxu2 %v1700_v53 }
 0x171   :  { %v1722_v19 = vpop.f32.mrf.mxu3 }
 0x172   :  { %v1687_v55 = vpop.f32.mrf.mxu1 }
 0x173   :  { %1781 = vmatmul.f32.vlgmr.msrb.gmra.mxu2 %v1704_v54 }
 0x195   :  { %v1742_v56 = vpop.f32.mrf.mxu3 }
 0x196   :  { %v1743_v57 = vadd.f32 %v1742_v56, %v1722_v19 }
 0x1ca   :  { %v1762_v58 = vpop.f32.mrf.mxu1 }
 0x1cb   :  { %v1763_v60 = vadd.f32 %v1762_v58, %v1743_v57 }
 0x1f6   :  { %v1782_v62 = vpop.f32.mrf.mxu2 }
 0x1f7   :  { %v1783_v63 = vadd.f32 %v1782_v62, %v1763_v60 }
 0x1f9   :  { %v1792_v0 = vadd.f32 %v1791_v61, %v1783_v63 }
 0x1fb   :  { %v1793_v1 = vmax.f32 %v1792_v0, -30.0 }
 0x1fd   :  { %v1794_v2 = vsub.f32 0.0, %v1793_v1 }
 0x1ff   :  { %v1795_v3 = vmul.f32 1.442695, %v1794_v2 }
 0x201   :  { %2815 = vpow2.f32 %v1795_v3 }
 0x207   :  { %v2816_v5 = vpop.eup %2815 }
 0x208   :  { %v1797_v7 = vadd.f32 1.0, %v2816_v5 }
 0x20a   :  { %2817 = vrcp.f32 %v1797_v7 }
 0x210   :  { %v2818_v8 = vpop.eup %2817 }
 0x211   :  { %1800 = vst.msk [vmem:[#allocation11] sm:$0x1] %vm1799_vm5, %v2818_v8 }
 0x212   :  { %1811 = dma.vmem_to_hbm [thread:$0]  %s1807_s3, 16, %s1809_s18, [#allocation5]  }
 0x213   :  { %2945 = dma.done.wait [#allocation5], 16  }
 0x214   :  { %2946 = vsyncadd [#allocation5], 4294967280 }
 0x215   :  { %1816 = vsyncpa [#allocation4], 1 }
 0x216   :  { %1817 = vsyncpa [#allocation7], 1 }
 0x217   :  { %1818 = vsyncpa [#allocation10], 1 }
 0x218   :  { %1819 = vsyncpa [#allocation5], 1 }

</bundles_post_ra>
